<compile_context>
chip_gen: v6e
topology: v6e:2x2x1
jax: 0.10.0
libtpu: 0.0.40
codegen_flags: <defaults>
</compile_context>

<pallas_src>
import jax
import jax.numpy as jnp
from jax.experimental import pallas as pl
from jax.experimental.pallas import tpu as pltpu

EMB = 100
HID = 128
LANE = 128


def _round_up(x, m):
    return ((x + m - 1) // m) * m


# --------------------------------------------------------------------------
# Fused kernel: input projection + LSTM recurrence + final Linear
# --------------------------------------------------------------------------
def _make_lstm_kernel(seq_len, t_blk, b_blk):
    H = HID
    needs_mask = (seq_len % t_blk) != 0

    def kernel(x_ref, wih_ref, whh_ref, b_ref, wfc_ref, bfc_ref, out_ref,
               h_sc, c_sc, xw_sc):
        tb = pl.program_id(1)                    # time-block index (arbitrary)
        last_tb = pl.num_programs(1) - 1

        @pl.when(tb == 0)
        def _init():
            h_sc[...] = jnp.zeros_like(h_sc)
            c_sc[...] = jnp.zeros_like(c_sc)

        # ---- fused input projection (no h dependence): one big MXU matmul
        # per grid step, M = T_BLK*B_BLK rows, K = 128, N = 4H.  Result stays
        # f32 in VMEM scratch (bias folded here, once).
        xw_sc[...] = (jnp.dot(x_ref[...], wih_ref[...],
                              preferred_element_type=jnp.float32)
                      + b_ref[...])

        whh = whh_ref[...]   # (H, 4H) bf16; constant block index -> resident

        def make_step(masked):
            def step(k, carry):
                h_prev, c_prev = carry
                # Only the h-dependent matmul is on the sequential path.
                gates = (xw_sc[pl.ds(k * b_blk, b_blk), :]
                         + jnp.dot(h_prev.astype(jnp.bfloat16), whh,
                                   preferred_element_type=jnp.float32))
                i_g = jax.nn.sigmoid(gates[:, 0 * H:1 * H])
                f_g = jax.nn.sigmoid(gates[:, 1 * H:2 * H])
                g_g = jnp.tanh(gates[:, 2 * H:3 * H])
                o_g = jax.nn.sigmoid(gates[:, 3 * H:4 * H])
                c_new = f_g * c_prev + i_g * g_g
                h_new = o_g * jnp.tanh(c_new)
                if masked:
                    # Padded tail timesteps must not advance the state.
                    valid = (tb * t_blk + k) < seq_len
                    h_new = jnp.where(valid, h_new, h_prev)
                    c_new = jnp.where(valid, c_new, c_prev)
                return (h_new, c_new)
            return step

        def run(masked):
            h, c = jax.lax.fori_loop(0, t_blk, make_step(masked),
                                     (h_sc[...], c_sc[...]), unroll=True)
            h_sc[...] = h
            c_sc[...] = c

        if needs_mask:
            # Mask only the last (ragged) time block; full blocks run clean.
            @pl.when(tb == last_tb)
            def _tail():
                run(True)

            @pl.when(tb != last_tb)
            def _full():
                run(False)
        else:
            run(False)

        # NOTE: the output block index is constant across the time axis
        # ("arbitrary"), so writing only on the last time step is safe
        # (writeback is deferred until the batch-block index changes / grid
        # ends).  The batch axis is "parallel": out_spec and h/c scratch are
        # per batch block, so this stays correct under megacore sharding.
        @pl.when(tb == last_tb)
        def _finalize():
            logits = (jnp.dot(h_sc[...].astype(jnp.bfloat16), wfc_ref[...],
                              preferred_element_type=jnp.float32)
                      + bfc_ref[...])
            out_ref[...] = logits.astype(out_ref.dtype)

    return kernel


# --------------------------------------------------------------------------
# Wrapper
# --------------------------------------------------------------------------
def lstm_classifier_forward(token_ids, params, t_blk_max=32, b_blk_max=64):
    """token_ids: (B, T) int32 -> logits (B, num_classes) float32.

    t_blk_max: timesteps per grid step (sweep 32/64 on v5e/v6e; per-buffer
    slab here is only ~1 MiB so v7x's 64 MiB VMEM is never a constraint).
    b_blk_max: batch rows per grid step (<=64 keeps h/c/gates vreg-resident).
    """
    emb_tbl = params["embedding"]                       # (V, EMB) f32
    wih_t = params["w_ih_t"]                            # (EMB, 4H) f32
    whh_t = params["w_hh_t"].astype(jnp.bfloat16)       # (H, 4H)
    b = params["b"]                                     # (1, 4H) f32
    wfc_t = params["w_fc_t"]                            # (H, C) f32
    bfc = params["b_fc"]                                # (1, C) f32

    B, T = token_ids.shape
    C = wfc_t.shape[1]
    G = 4 * HID

    # Zero-pad embedding dim 100 -> 128 (free: HBM layout already pads the
    # minor dim to 128 lanes) and cast the table to bf16 BEFORE the gather,
    # halving the gather writeback and the kernel's x DMA.
    E_pad = _round_up(EMB, LANE)
    emb_p = jnp.zeros((emb_tbl.shape[0], E_pad), jnp.bfloat16)
    emb_p = emb_p.at[:, :EMB].set(emb_tbl.astype(jnp.bfloat16))
    wih_p = jnp.zeros((E_pad, G), jnp.bfloat16)
    wih_p = wih_p.at[:EMB, :].set(wih_t.astype(jnp.bfloat16))

    # Lane-pad the classifier head so the single logits store is unmasked.
    C_pad = max(LANE, _round_up(C, LANE))
    wfc_p = jnp.zeros((HID, C_pad), jnp.bfloat16).at[:, :C].set(
        wfc_t.astype(jnp.bfloat16))
    bfc_p = jnp.zeros((1, C_pad), jnp.float32).at[:, :C].set(bfc)

    # Time blocking: multiple timesteps per grid step.
    T_BLK = min(T, t_blk_max)
    n_tb = pl.cdiv(T, T_BLK)
    T_pad = n_tb * T_BLK

    # Batch blocking: sublane-aligned, vreg-friendly, v7x core-parallel.
    B_BLK = min(b_blk_max, _round_up(B, 8))
    n_bb = pl.cdiv(B, B_BLK)
    B_pad = n_bb * B_BLK

    ids = token_ids
    if T_pad != T or B_pad != B:
        ids = jnp.pad(ids, ((0, B_pad - B), (0, T_pad - T)))

    # Transpose only the tiny id matrix (never the (T,B,E) activation) so the
    # embedding gather writes x directly in batch-block-major, time-major,
    # row-flattened layout: (n_bb, T_pad*B_BLK, E_pad) bf16.
    ids_bm = ids.reshape(n_bb, B_BLK, T_pad).transpose(0, 2, 1)
    x = jnp.take(emb_p, ids_bm, axis=0)           # (n_bb, T_pad, B_BLK, E_pad)
    x = x.reshape(n_bb, T_pad * B_BLK, E_pad)     # leading-dim merge, no copy

    out_p = pl.pallas_call(
        _make_lstm_kernel(T, T_BLK, B_BLK),
        out_shape=jax.ShapeDtypeStruct((B_pad, C_pad), jnp.float32),
        grid_spec=pltpu.PrefetchScalarGridSpec(
            num_scalar_prefetch=0,
            grid=(n_bb, n_tb),
            in_specs=[
                # x slab for this (batch-block, time-block)
                pl.BlockSpec((None, T_BLK * B_BLK, E_pad),
                             lambda bb, tb: (bb, tb, 0)),
                pl.BlockSpec((E_pad, G), lambda bb, tb: (0, 0)),    # W_ih^T
                pl.BlockSpec((HID, G), lambda bb, tb: (0, 0)),      # W_hh^T
                pl.BlockSpec((1, G), lambda bb, tb: (0, 0)),        # b_ih+b_hh
                pl.BlockSpec((HID, C_pad), lambda bb, tb: (0, 0)),  # W_fc^T
                pl.BlockSpec((1, C_pad), lambda bb, tb: (0, 0)),    # b_fc
            ],
            out_specs=pl.BlockSpec((B_BLK, C_pad), lambda bb, tb: (bb, 0)),
            scratch_shapes=[
                pltpu.VMEM((B_BLK, HID), jnp.float32),          # h carry
                pltpu.VMEM((B_BLK, HID), jnp.float32),          # c carry
                pltpu.VMEM((T_BLK * B_BLK, G), jnp.float32),    # fused xW (f32)
            ],
        ),
        compiler_params=pltpu.CompilerParams(
            dimension_semantics=("parallel", "arbitrary"),
            vmem_limit_bytes=32 * 1024 * 1024),
    )(x, wih_p, whh_t, b, wfc_p, bfc_p)

    return out_p[:B, :C]


# --------------------------------------------------------------------------
# Params + pure-JAX reference (PyTorch semantics, f32)
# --------------------------------------------------------------------------
def init_params(vocab_size, num_classes, key):
    k = jax.random.split(key, 6)
    scale = 1.0 / jnp.sqrt(HID)
    embedding = jax.random.normal(k[0], (vocab_size, EMB), jnp.float32)
    w_ih = jax.random.uniform(k[1], (4 * HID, EMB), jnp.float32, -scale, scale)
    w_hh = jax.random.uniform(k[2], (4 * HID, HID), jnp.float32, -scale, scale)
    b_ih = jax.random.uniform(k[3], (4 * HID,), jnp.float32, -scale, scale)
    b_hh = jax.random.uniform(k[4], (4 * HID,), jnp.float32, -scale, scale)
    w_fc = jax.random.uniform(k[5], (num_classes, HID), jnp.float32,
                              -scale, scale)
    b_fc = jnp.zeros((num_classes,), jnp.float32)
    return {
        "embedding": embedding,
        "w_ih_t": w_ih.T,                    # (EMB, 4H)
        "w_hh_t": w_hh.T,                    # (H, 4H)
        "b": (b_ih + b_hh)[None, :],         # (1, 4H)
        "w_fc_t": w_fc.T,                    # (H, C)
        "b_fc": b_fc[None, :],               # (1, C)
    }


def reference_forward(token_ids, params):
    x = jnp.take(params["embedding"], token_ids, axis=0)   # (B, T, E)
    B = x.shape[0]
    h = jnp.zeros((B, HID), jnp.float32)
    c = jnp.zeros((B, HID), jnp.float32)

    def step(carry, x_t):
        h, c = carry
        gates = x_t @ params["w_ih_t"] + h @ params["w_hh_t"] + params["b"]
        i = jax.nn.sigmoid(gates[:, 0 * HID:1 * HID])
        f = jax.nn.sigmoid(gates[:, 1 * HID:2 * HID])
        g = jnp.tanh(gates[:, 2 * HID:3 * HID])
        o = jax.nn.sigmoid(gates[:, 3 * HID:4 * HID])
        c = f * c + i * g
        h = o * jnp.tanh(c)
        return (h, c), None

    (h, _), _ = jax.lax.scan(step, (h, c), jnp.transpose(x, (1, 0, 2)))
    return h @ params["w_fc_t"] + params["b_fc"]


if __name__ == "__main__":
    vocab_size = 64
    num_classes = 4
    B, T = 2, 8

    key = jax.random.PRNGKey(0)
    k_param, k_tok = jax.random.split(key)
    params = init_params(vocab_size, num_classes, k_param)
    token_ids = jax.random.randint(k_tok, (B, T), 0, vocab_size, jnp.int32)

    logits = lstm_classifier_forward(token_ids, params)
    logits = jax.block_until_ready(logits)

    ref = reference_forward(token_ids, params)
    assert logits.shape == (B, num_classes)
    # bf16 MXU inputs -> bf16-class error vs the pure-f32 reference.
    assert jnp.allclose(logits, ref, atol=3e-2, rtol=3e-2)

    print("KERNEL_OK")
</pallas_src>

<mosaic_0001>
module attributes {stable_mosaic.version = 11 : i64} {
  func.func @kernel(%arg0: i32, %arg1: i32, %arg2: memref<1x64x128xbf16, #tpu.memory_space<vmem>>, %arg3: memref<128x512xbf16, #tpu.memory_space<vmem>>, %arg4: memref<128x512xbf16, #tpu.memory_space<vmem>>, %arg5: memref<1x512xf32, #tpu.memory_space<vmem>>, %arg6: memref<128x128xbf16, #tpu.memory_space<vmem>>, %arg7: memref<1x128xf32, #tpu.memory_space<vmem>>, %arg8: memref<8x128xf32, #tpu.memory_space<vmem>>, %arg9: memref<8x128xf32, #tpu.memory_space<vmem>>, %arg10: memref<8x128xf32, #tpu.memory_space<vmem>>, %arg11: memref<64x512xf32, #tpu.memory_space<vmem>>) attributes {dimension_semantics = [#tpu.dimension_semantics<parallel>, #tpu.dimension_semantics<arbitrary>], iteration_bounds = array<i64: 1, 1>, scalar_prefetch = 0 : i64, scratch_operands = 3 : i64, tpu.core_type = #tpu.core_type<tc>, window_params = [{transform_indices = @transform_0, window_bounds = array<i64: 1, 64, 128>}, {pipeline_mode = #tpu.pipeline_mode<synchronous>, transform_indices = @transform_1, window_bounds = array<i64: 128, 512>}, {pipeline_mode = #tpu.pipeline_mode<synchronous>, transform_indices = @transform_2, window_bounds = array<i64: 128, 512>}, {pipeline_mode = #tpu.pipeline_mode<synchronous>, transform_indices = @transform_3, window_bounds = array<i64: 1, 512>}, {pipeline_mode = #tpu.pipeline_mode<synchronous>, transform_indices = @transform_4, window_bounds = array<i64: 128, 128>}, {pipeline_mode = #tpu.pipeline_mode<synchronous>, transform_indices = @transform_5, window_bounds = array<i64: 1, 128>}, {transform_indices = @transform_6, window_bounds = array<i64: 8, 128>}]} {
    %c0_i32 = arith.constant 0 : i32
    %0 = arith.cmpi eq, %arg1, %c0_i32 : i32
    %1 = arith.extui %0 : i1 to i32
    %c0_i32_0 = arith.constant 0 : i32
    %2 = arith.cmpi ne, %1, %c0_i32_0 : i32
    scf.if %2 {
      %cst_70 = arith.constant 0.000000e+00 : f32
      %267 = vector.broadcast %cst_70 : f32 to vector<8x128xf32>
      %c0_71 = arith.constant 0 : index
      %c0_72 = arith.constant 0 : index
      %268 = vector.load %arg9[%c0_71, %c0_72] : memref<8x128xf32, #tpu.memory_space<vmem>>, vector<8x128xf32>
      tpu.vector_store %arg9[%c0_71, %c0_72], %267 {strides = array<i32>} : memref<8x128xf32, #tpu.memory_space<vmem>>, vector<8x128xf32>,
      %cst_73 = arith.constant 0.000000e+00 : f32
      %269 = vector.broadcast %cst_73 : f32 to vector<8x128xf32>
      %c0_74 = arith.constant 0 : index
      %c0_75 = arith.constant 0 : index
      %270 = vector.load %arg10[%c0_74, %c0_75] : memref<8x128xf32, #tpu.memory_space<vmem>>, vector<8x128xf32>
      tpu.vector_store %arg10[%c0_74, %c0_75], %269 {strides = array<i32>} : memref<8x128xf32, #tpu.memory_space<vmem>>, vector<8x128xf32>,
    } else {
    }
    %c0 = arith.constant 0 : index
    %c0_1 = arith.constant 0 : index
    %c0_2 = arith.constant 0 : index
    %3 = vector.load %arg2[%c0, %c0_1, %c0_2] : memref<1x64x128xbf16, #tpu.memory_space<vmem>>, vector<1x64x128xbf16>
    %4 = vector.shape_cast %3 : vector<1x64x128xbf16> to vector<64x128xbf16>
    %c0_3 = arith.constant 0 : index
    %c0_4 = arith.constant 0 : index
    %5 = vector.load %arg3[%c0_3, %c0_4] : memref<128x512xbf16, #tpu.memory_space<vmem>>, vector<128x512xbf16>
    %cst = arith.constant dense<0.000000e+00> : vector<64x512xf32>
    %6 = tpu.matmul %4, %5, %cst {dimension_numbers = #tpu.dot_dimension_numbers<[1], [0], [0], [1], [0, 0, 1, 1], [], []>} : vector<64x128xbf16>, vector<128x512xbf16>, vector<64x512xf32> -> vector<64x512xf32>
    %c0_5 = arith.constant 0 : index
    %c0_6 = arith.constant 0 : index
    %7 = vector.load %arg5[%c0_5, %c0_6] : memref<1x512xf32, #tpu.memory_space<vmem>>, vector<1x512xf32>
    %8 = vector.broadcast %7 : vector<1x512xf32> to vector<64x512xf32>
    %9 = arith.addf %6, %8 : vector<64x512xf32>
    %c0_7 = arith.constant 0 : index
    %c0_8 = arith.constant 0 : index
    %10 = vector.load %arg11[%c0_7, %c0_8] : memref<64x512xf32, #tpu.memory_space<vmem>>, vector<64x512xf32>
    tpu.vector_store %arg11[%c0_7, %c0_8], %9 {strides = array<i32>} : memref<64x512xf32, #tpu.memory_space<vmem>>, vector<64x512xf32>,
    %c0_9 = arith.constant 0 : index
    %c0_10 = arith.constant 0 : index
    %11 = vector.load %arg4[%c0_9, %c0_10] : memref<128x512xbf16, #tpu.memory_space<vmem>>, vector<128x512xbf16>
    %c0_11 = arith.constant 0 : index
    %c0_12 = arith.constant 0 : index
    %12 = vector.load %arg9[%c0_11, %c0_12] : memref<8x128xf32, #tpu.memory_space<vmem>>, vector<8x128xf32>
    %c0_13 = arith.constant 0 : index
    %c0_14 = arith.constant 0 : index
    %13 = vector.load %arg10[%c0_13, %c0_14] : memref<8x128xf32, #tpu.memory_space<vmem>>, vector<8x128xf32>
    %c0_i32_15 = arith.constant 0 : i32
    %c8_i32 = arith.constant 8 : i32
    %14 = arith.muli %c0_i32_15, %c8_i32 : i32
    %15 = arith.index_cast %14 : i32 to index
    %c0_16 = arith.constant 0 : index
    %16 = vector.load %arg11[%15, %c0_16] : memref<64x512xf32, #tpu.memory_space<vmem>>, vector<8x512xf32>
    %17 = arith.truncf %12 : vector<8x128xf32> to vector<8x128xbf16>
    %cst_17 = arith.constant dense<0.000000e+00> : vector<8x512xf32>
    %18 = tpu.matmul %17, %11, %cst_17 {dimension_numbers = #tpu.dot_dimension_numbers<[1], [0], [0], [1], [0, 0, 1, 1], [], []>} : vector<8x128xbf16>, vector<128x512xbf16>, vector<8x512xf32> -> vector<8x512xf32>
    %19 = arith.addf %16, %18 : vector<8x512xf32>
    %20 = vector.extract_strided_slice %19 {offsets = [0, 0], sizes = [8, 128], strides = [1, 1]} : vector<8x512xf32> to vector<8x128xf32>
    %21 = arith.negf %20 : vector<8x128xf32>
    %22 = math.exp %21 : vector<8x128xf32>
    %cst_18 = arith.constant 1.000000e+00 : f32
    %23 = vector.broadcast %cst_18 : f32 to vector<8x128xf32>
    %24 = arith.addf %23, %22 : vector<8x128xf32>
    %25 = arith.divf %23, %24 : vector<8x128xf32>
    %26 = vector.extract_strided_slice %19 {offsets = [0, 128], sizes = [8, 128], strides = [1, 1]} : vector<8x512xf32> to vector<8x128xf32>
    %27 = arith.negf %26 : vector<8x128xf32>
    %28 = math.exp %27 : vector<8x128xf32>
    %cst_19 = arith.constant 1.000000e+00 : f32
    %29 = vector.broadcast %cst_19 : f32 to vector<8x128xf32>
    %30 = arith.addf %29, %28 : vector<8x128xf32>
    %31 = arith.divf %29, %30 : vector<8x128xf32>
    %32 = vector.extract_strided_slice %19 {offsets = [0, 256], sizes = [8, 128], strides = [1, 1]} : vector<8x512xf32> to vector<8x128xf32>
    %33 = math.tanh %32 : vector<8x128xf32>
    %34 = vector.extract_strided_slice %19 {offsets = [0, 384], sizes = [8, 128], strides = [1, 1]} : vector<8x512xf32> to vector<8x128xf32>
    %35 = arith.negf %34 : vector<8x128xf32>
    %36 = math.exp %35 : vector<8x128xf32>
    %cst_20 = arith.constant 1.000000e+00 : f32
    %37 = vector.broadcast %cst_20 : f32 to vector<8x128xf32>
    %38 = arith.addf %37, %36 : vector<8x128xf32>
    %39 = arith.divf %37, %38 : vector<8x128xf32>
    %40 = arith.mulf %31, %13 : vector<8x128xf32>
    %41 = arith.mulf %25, %33 : vector<8x128xf32>
    %42 = arith.addf %40, %41 : vector<8x128xf32>
    %43 = math.tanh %42 : vector<8x128xf32>
    %44 = arith.mulf %39, %43 : vector<8x128xf32>
    %c1_i32 = arith.constant 1 : i32
    %c8_i32_21 = arith.constant 8 : i32
    %45 = arith.muli %c1_i32, %c8_i32_21 : i32
    %46 = arith.index_cast %45 : i32 to index
    %c0_22 = arith.constant 0 : index
    %47 = vector.load %arg11[%46, %c0_22] : memref<64x512xf32, #tpu.memory_space<vmem>>, vector<8x512xf32>
    %48 = arith.truncf %44 : vector<8x128xf32> to vector<8x128xbf16>
    %cst_23 = arith.constant dense<0.000000e+00> : vector<8x512xf32>
    %49 = tpu.matmul %48, %11, %cst_23 {dimension_numbers = #tpu.dot_dimension_numbers<[1], [0], [0], [1], [0, 0, 1, 1], [], []>} : vector<8x128xbf16>, vector<128x512xbf16>, vector<8x512xf32> -> vector<8x512xf32>
    %50 = arith.addf %47, %49 : vector<8x512xf32>
    %51 = vector.extract_strided_slice %50 {offsets = [0, 0], sizes = [8, 128], strides = [1, 1]} : vector<8x512xf32> to vector<8x128xf32>
    %52 = arith.negf %51 : vector<8x128xf32>
    %53 = math.exp %52 : vector<8x128xf32>
    %cst_24 = arith.constant 1.000000e+00 : f32
    %54 = vector.broadcast %cst_24 : f32 to vector<8x128xf32>
    %55 = arith.addf %54, %53 : vector<8x128xf32>
    %56 = arith.divf %54, %55 : vector<8x128xf32>
    %57 = vector.extract_strided_slice %50 {offsets = [0, 128], sizes = [8, 128], strides = [1, 1]} : vector<8x512xf32> to vector<8x128xf32>
    %58 = arith.negf %57 : vector<8x128xf32>
    %59 = math.exp %58 : vector<8x128xf32>
    %cst_25 = arith.constant 1.000000e+00 : f32
    %60 = vector.broadcast %cst_25 : f32 to vector<8x128xf32>
    %61 = arith.addf %60, %59 : vector<8x128xf32>
    %62 = arith.divf %60, %61 : vector<8x128xf32>
    %63 = vector.extract_strided_slice %50 {offsets = [0, 256], sizes = [8, 128], strides = [1, 1]} : vector<8x512xf32> to vector<8x128xf32>
    %64 = math.tanh %63 : vector<8x128xf32>
    %65 = vector.extract_strided_slice %50 {offsets = [0, 384], sizes = [8, 128], strides = [1, 1]} : vector<8x512xf32> to vector<8x128xf32>
    %66 = arith.negf %65 : vector<8x128xf32>
    %67 = math.exp %66 : vector<8x128xf32>
    %cst_26 = arith.constant 1.000000e+00 : f32
    %68 = vector.broadcast %cst_26 : f32 to vector<8x128xf32>
    %69 = arith.addf %68, %67 : vector<8x128xf32>
    %70 = arith.divf %68, %69 : vector<8x128xf32>
    %71 = arith.mulf %62, %42 : vector<8x128xf32>
    %72 = arith.mulf %56, %64 : vector<8x128xf32>
    %73 = arith.addf %71, %72 : vector<8x128xf32>
    %74 = math.tanh %73 : vector<8x128xf32>
    %75 = arith.mulf %70, %74 : vector<8x128xf32>
    %c2_i32 = arith.constant 2 : i32
    %c8_i32_27 = arith.constant 8 : i32
    %76 = arith.muli %c2_i32, %c8_i32_27 : i32
    %77 = arith.index_cast %76 : i32 to index
    %c0_28 = arith.constant 0 : index
    %78 = vector.load %arg11[%77, %c0_28] : memref<64x512xf32, #tpu.memory_space<vmem>>, vector<8x512xf32>
    %79 = arith.truncf %75 : vector<8x128xf32> to vector<8x128xbf16>
    %cst_29 = arith.constant dense<0.000000e+00> : vector<8x512xf32>
    %80 = tpu.matmul %79, %11, %cst_29 {dimension_numbers = #tpu.dot_dimension_numbers<[1], [0], [0], [1], [0, 0, 1, 1], [], []>} : vector<8x128xbf16>, vector<128x512xbf16>, vector<8x512xf32> -> vector<8x512xf32>
    %81 = arith.addf %78, %80 : vector<8x512xf32>
    %82 = vector.extract_strided_slice %81 {offsets = [0, 0], sizes = [8, 128], strides = [1, 1]} : vector<8x512xf32> to vector<8x128xf32>
    %83 = arith.negf %82 : vector<8x128xf32>
    %84 = math.exp %83 : vector<8x128xf32>
    %cst_30 = arith.constant 1.000000e+00 : f32
    %85 = vector.broadcast %cst_30 : f32 to vector<8x128xf32>
    %86 = arith.addf %85, %84 : vector<8x128xf32>
    %87 = arith.divf %85, %86 : vector<8x128xf32>
    %88 = vector.extract_strided_slice %81 {offsets = [0, 128], sizes = [8, 128], strides = [1, 1]} : vector<8x512xf32> to vector<8x128xf32>
    %89 = arith.negf %88 : vector<8x128xf32>
    %90 = math.exp %89 : vector<8x128xf32>
    %cst_31 = arith.constant 1.000000e+00 : f32
    %91 = vector.broadcast %cst_31 : f32 to vector<8x128xf32>
    %92 = arith.addf %91, %90 : vector<8x128xf32>
    %93 = arith.divf %91, %92 : vector<8x128xf32>
    %94 = vector.extract_strided_slice %81 {offsets = [0, 256], sizes = [8, 128], strides = [1, 1]} : vector<8x512xf32> to vector<8x128xf32>
    %95 = math.tanh %94 : vector<8x128xf32>
    %96 = vector.extract_strided_slice %81 {offsets = [0, 384], sizes = [8, 128], strides = [1, 1]} : vector<8x512xf32> to vector<8x128xf32>
    %97 = arith.negf %96 : vector<8x128xf32>
    %98 = math.exp %97 : vector<8x128xf32>
    %cst_32 = arith.constant 1.000000e+00 : f32
    %99 = vector.broadcast %cst_32 : f32 to vector<8x128xf32>
    %100 = arith.addf %99, %98 : vector<8x128xf32>
    %101 = arith.divf %99, %100 : vector<8x128xf32>
    %102 = arith.mulf %93, %73 : vector<8x128xf32>
    %103 = arith.mulf %87, %95 : vector<8x128xf32>
    %104 = arith.addf %102, %103 : vector<8x128xf32>
    %105 = math.tanh %104 : vector<8x128xf32>
    %106 = arith.mulf %101, %105 : vector<8x128xf32>
    %c3_i32 = arith.constant 3 : i32
    %c8_i32_33 = arith.constant 8 : i32
    %107 = arith.muli %c3_i32, %c8_i32_33 : i32
    %108 = arith.index_cast %107 : i32 to index
    %c0_34 = arith.constant 0 : index
    %109 = vector.load %arg11[%108, %c0_34] : memref<64x512xf32, #tpu.memory_space<vmem>>, vector<8x512xf32>
    %110 = arith.truncf %106 : vector<8x128xf32> to vector<8x128xbf16>
    %cst_35 = arith.constant dense<0.000000e+00> : vector<8x512xf32>
    %111 = tpu.matmul %110, %11, %cst_35 {dimension_numbers = #tpu.dot_dimension_numbers<[1], [0], [0], [1], [0, 0, 1, 1], [], []>} : vector<8x128xbf16>, vector<128x512xbf16>, vector<8x512xf32> -> vector<8x512xf32>
    %112 = arith.addf %109, %111 : vector<8x512xf32>
    %113 = vector.extract_strided_slice %112 {offsets = [0, 0], sizes = [8, 128], strides = [1, 1]} : vector<8x512xf32> to vector<8x128xf32>
    %114 = arith.negf %113 : vector<8x128xf32>
    %115 = math.exp %114 : vector<8x128xf32>
    %cst_36 = arith.constant 1.000000e+00 : f32
    %116 = vector.broadcast %cst_36 : f32 to vector<8x128xf32>
    %117 = arith.addf %116, %115 : vector<8x128xf32>
    %118 = arith.divf %116, %117 : vector<8x128xf32>
    %119 = vector.extract_strided_slice %112 {offsets = [0, 128], sizes = [8, 128], strides = [1, 1]} : vector<8x512xf32> to vector<8x128xf32>
    %120 = arith.negf %119 : vector<8x128xf32>
    %121 = math.exp %120 : vector<8x128xf32>
    %cst_37 = arith.constant 1.000000e+00 : f32
    %122 = vector.broadcast %cst_37 : f32 to vector<8x128xf32>
    %123 = arith.addf %122, %121 : vector<8x128xf32>
    %124 = arith.divf %122, %123 : vector<8x128xf32>
    %125 = vector.extract_strided_slice %112 {offsets = [0, 256], sizes = [8, 128], strides = [1, 1]} : vector<8x512xf32> to vector<8x128xf32>
    %126 = math.tanh %125 : vector<8x128xf32>
    %127 = vector.extract_strided_slice %112 {offsets = [0, 384], sizes = [8, 128], strides = [1, 1]} : vector<8x512xf32> to vector<8x128xf32>
    %128 = arith.negf %127 : vector<8x128xf32>
    %129 = math.exp %128 : vector<8x128xf32>
    %cst_38 = arith.constant 1.000000e+00 : f32
    %130 = vector.broadcast %cst_38 : f32 to vector<8x128xf32>
    %131 = arith.addf %130, %129 : vector<8x128xf32>
    %132 = arith.divf %130, %131 : vector<8x128xf32>
    %133 = arith.mulf %124, %104 : vector<8x128xf32>
    %134 = arith.mulf %118, %126 : vector<8x128xf32>
    %135 = arith.addf %133, %134 : vector<8x128xf32>
    %136 = math.tanh %135 : vector<8x128xf32>
    %137 = arith.mulf %132, %136 : vector<8x128xf32>
    %c4_i32 = arith.constant 4 : i32
    %c8_i32_39 = arith.constant 8 : i32
    %138 = arith.muli %c4_i32, %c8_i32_39 : i32
    %139 = arith.index_cast %138 : i32 to index
    %c0_40 = arith.constant 0 : index
    %140 = vector.load %arg11[%139, %c0_40] : memref<64x512xf32, #tpu.memory_space<vmem>>, vector<8x512xf32>
    %141 = arith.truncf %137 : vector<8x128xf32> to vector<8x128xbf16>
    %cst_41 = arith.constant dense<0.000000e+00> : vector<8x512xf32>
    %142 = tpu.matmul %141, %11, %cst_41 {dimension_numbers = #tpu.dot_dimension_numbers<[1], [0], [0], [1], [0, 0, 1, 1], [], []>} : vector<8x128xbf16>, vector<128x512xbf16>, vector<8x512xf32> -> vector<8x512xf32>
    %143 = arith.addf %140, %142 : vector<8x512xf32>
    %144 = vector.extract_strided_slice %143 {offsets = [0, 0], sizes = [8, 128], strides = [1, 1]} : vector<8x512xf32> to vector<8x128xf32>
    %145 = arith.negf %144 : vector<8x128xf32>
    %146 = math.exp %145 : vector<8x128xf32>
    %cst_42 = arith.constant 1.000000e+00 : f32
    %147 = vector.broadcast %cst_42 : f32 to vector<8x128xf32>
    %148 = arith.addf %147, %146 : vector<8x128xf32>
    %149 = arith.divf %147, %148 : vector<8x128xf32>
    %150 = vector.extract_strided_slice %143 {offsets = [0, 128], sizes = [8, 128], strides = [1, 1]} : vector<8x512xf32> to vector<8x128xf32>
    %151 = arith.negf %150 : vector<8x128xf32>
    %152 = math.exp %151 : vector<8x128xf32>
    %cst_43 = arith.constant 1.000000e+00 : f32
    %153 = vector.broadcast %cst_43 : f32 to vector<8x128xf32>
    %154 = arith.addf %153, %152 : vector<8x128xf32>
    %155 = arith.divf %153, %154 : vector<8x128xf32>
    %156 = vector.extract_strided_slice %143 {offsets = [0, 256], sizes = [8, 128], strides = [1, 1]} : vector<8x512xf32> to vector<8x128xf32>
    %157 = math.tanh %156 : vector<8x128xf32>
    %158 = vector.extract_strided_slice %143 {offsets = [0, 384], sizes = [8, 128], strides = [1, 1]} : vector<8x512xf32> to vector<8x128xf32>
    %159 = arith.negf %158 : vector<8x128xf32>
    %160 = math.exp %159 : vector<8x128xf32>
    %cst_44 = arith.constant 1.000000e+00 : f32
    %161 = vector.broadcast %cst_44 : f32 to vector<8x128xf32>
    %162 = arith.addf %161, %160 : vector<8x128xf32>
    %163 = arith.divf %161, %162 : vector<8x128xf32>
    %164 = arith.mulf %155, %135 : vector<8x128xf32>
    %165 = arith.mulf %149, %157 : vector<8x128xf32>
    %166 = arith.addf %164, %165 : vector<8x128xf32>
    %167 = math.tanh %166 : vector<8x128xf32>
    %168 = arith.mulf %163, %167 : vector<8x128xf32>
    %c5_i32 = arith.constant 5 : i32
    %c8_i32_45 = arith.constant 8 : i32
    %169 = arith.muli %c5_i32, %c8_i32_45 : i32
    %170 = arith.index_cast %169 : i32 to index
    %c0_46 = arith.constant 0 : index
    %171 = vector.load %arg11[%170, %c0_46] : memref<64x512xf32, #tpu.memory_space<vmem>>, vector<8x512xf32>
    %172 = arith.truncf %168 : vector<8x128xf32> to vector<8x128xbf16>
    %cst_47 = arith.constant dense<0.000000e+00> : vector<8x512xf32>
    %173 = tpu.matmul %172, %11, %cst_47 {dimension_numbers = #tpu.dot_dimension_numbers<[1], [0], [0], [1], [0, 0, 1, 1], [], []>} : vector<8x128xbf16>, vector<128x512xbf16>, vector<8x512xf32> -> vector<8x512xf32>
    %174 = arith.addf %171, %173 : vector<8x512xf32>
    %175 = vector.extract_strided_slice %174 {offsets = [0, 0], sizes = [8, 128], strides = [1, 1]} : vector<8x512xf32> to vector<8x128xf32>
    %176 = arith.negf %175 : vector<8x128xf32>
    %177 = math.exp %176 : vector<8x128xf32>
    %cst_48 = arith.constant 1.000000e+00 : f32
    %178 = vector.broadcast %cst_48 : f32 to vector<8x128xf32>
    %179 = arith.addf %178, %177 : vector<8x128xf32>
    %180 = arith.divf %178, %179 : vector<8x128xf32>
    %181 = vector.extract_strided_slice %174 {offsets = [0, 128], sizes = [8, 128], strides = [1, 1]} : vector<8x512xf32> to vector<8x128xf32>
    %182 = arith.negf %181 : vector<8x128xf32>
    %183 = math.exp %182 : vector<8x128xf32>
    %cst_49 = arith.constant 1.000000e+00 : f32
    %184 = vector.broadcast %cst_49 : f32 to vector<8x128xf32>
    %185 = arith.addf %184, %183 : vector<8x128xf32>
    %186 = arith.divf %184, %185 : vector<8x128xf32>
    %187 = vector.extract_strided_slice %174 {offsets = [0, 256], sizes = [8, 128], strides = [1, 1]} : vector<8x512xf32> to vector<8x128xf32>
    %188 = math.tanh %187 : vector<8x128xf32>
    %189 = vector.extract_strided_slice %174 {offsets = [0, 384], sizes = [8, 128], strides = [1, 1]} : vector<8x512xf32> to vector<8x128xf32>
    %190 = arith.negf %189 : vector<8x128xf32>
    %191 = math.exp %190 : vector<8x128xf32>
    %cst_50 = arith.constant 1.000000e+00 : f32
    %192 = vector.broadcast %cst_50 : f32 to vector<8x128xf32>
    %193 = arith.addf %192, %191 : vector<8x128xf32>
    %194 = arith.divf %192, %193 : vector<8x128xf32>
    %195 = arith.mulf %186, %166 : vector<8x128xf32>
    %196 = arith.mulf %180, %188 : vector<8x128xf32>
    %197 = arith.addf %195, %196 : vector<8x128xf32>
    %198 = math.tanh %197 : vector<8x128xf32>
    %199 = arith.mulf %194, %198 : vector<8x128xf32>
    %c6_i32 = arith.constant 6 : i32
    %c8_i32_51 = arith.constant 8 : i32
    %200 = arith.muli %c6_i32, %c8_i32_51 : i32
    %201 = arith.index_cast %200 : i32 to index
    %c0_52 = arith.constant 0 : index
    %202 = vector.load %arg11[%201, %c0_52] : memref<64x512xf32, #tpu.memory_space<vmem>>, vector<8x512xf32>
    %203 = arith.truncf %199 : vector<8x128xf32> to vector<8x128xbf16>
    %cst_53 = arith.constant dense<0.000000e+00> : vector<8x512xf32>
    %204 = tpu.matmul %203, %11, %cst_53 {dimension_numbers = #tpu.dot_dimension_numbers<[1], [0], [0], [1], [0, 0, 1, 1], [], []>} : vector<8x128xbf16>, vector<128x512xbf16>, vector<8x512xf32> -> vector<8x512xf32>
    %205 = arith.addf %202, %204 : vector<8x512xf32>
    %206 = vector.extract_strided_slice %205 {offsets = [0, 0], sizes = [8, 128], strides = [1, 1]} : vector<8x512xf32> to vector<8x128xf32>
    %207 = arith.negf %206 : vector<8x128xf32>
    %208 = math.exp %207 : vector<8x128xf32>
    %cst_54 = arith.constant 1.000000e+00 : f32
    %209 = vector.broadcast %cst_54 : f32 to vector<8x128xf32>
    %210 = arith.addf %209, %208 : vector<8x128xf32>
    %211 = arith.divf %209, %210 : vector<8x128xf32>
    %212 = vector.extract_strided_slice %205 {offsets = [0, 128], sizes = [8, 128], strides = [1, 1]} : vector<8x512xf32> to vector<8x128xf32>
    %213 = arith.negf %212 : vector<8x128xf32>
    %214 = math.exp %213 : vector<8x128xf32>
    %cst_55 = arith.constant 1.000000e+00 : f32
    %215 = vector.broadcast %cst_55 : f32 to vector<8x128xf32>
    %216 = arith.addf %215, %214 : vector<8x128xf32>
    %217 = arith.divf %215, %216 : vector<8x128xf32>
    %218 = vector.extract_strided_slice %205 {offsets = [0, 256], sizes = [8, 128], strides = [1, 1]} : vector<8x512xf32> to vector<8x128xf32>
    %219 = math.tanh %218 : vector<8x128xf32>
    %220 = vector.extract_strided_slice %205 {offsets = [0, 384], sizes = [8, 128], strides = [1, 1]} : vector<8x512xf32> to vector<8x128xf32>
    %221 = arith.negf %220 : vector<8x128xf32>
    %222 = math.exp %221 : vector<8x128xf32>
    %cst_56 = arith.constant 1.000000e+00 : f32
    %223 = vector.broadcast %cst_56 : f32 to vector<8x128xf32>
    %224 = arith.addf %223, %222 : vector<8x128xf32>
    %225 = arith.divf %223, %224 : vector<8x128xf32>
    %226 = arith.mulf %217, %197 : vector<8x128xf32>
    %227 = arith.mulf %211, %219 : vector<8x128xf32>
    %228 = arith.addf %226, %227 : vector<8x128xf32>
    %229 = math.tanh %228 : vector<8x128xf32>
    %230 = arith.mulf %225, %229 : vector<8x128xf32>
    %c7_i32 = arith.constant 7 : i32
    %c8_i32_57 = arith.constant 8 : i32
    %231 = arith.muli %c7_i32, %c8_i32_57 : i32
    %232 = arith.index_cast %231 : i32 to index
    %c0_58 = arith.constant 0 : index
    %233 = vector.load %arg11[%232, %c0_58] : memref<64x512xf32, #tpu.memory_space<vmem>>, vector<8x512xf32>
    %234 = arith.truncf %230 : vector<8x128xf32> to vector<8x128xbf16>
    %cst_59 = arith.constant dense<0.000000e+00> : vector<8x512xf32>
    %235 = tpu.matmul %234, %11, %cst_59 {dimension_numbers = #tpu.dot_dimension_numbers<[1], [0], [0], [1], [0, 0, 1, 1], [], []>} : vector<8x128xbf16>, vector<128x512xbf16>, vector<8x512xf32> -> vector<8x512xf32>
    %236 = arith.addf %233, %235 : vector<8x512xf32>
    %237 = vector.extract_strided_slice %236 {offsets = [0, 0], sizes = [8, 128], strides = [1, 1]} : vector<8x512xf32> to vector<8x128xf32>
    %238 = arith.negf %237 : vector<8x128xf32>
    %239 = math.exp %238 : vector<8x128xf32>
    %cst_60 = arith.constant 1.000000e+00 : f32
    %240 = vector.broadcast %cst_60 : f32 to vector<8x128xf32>
    %241 = arith.addf %240, %239 : vector<8x128xf32>
    %242 = arith.divf %240, %241 : vector<8x128xf32>
    %243 = vector.extract_strided_slice %236 {offsets = [0, 128], sizes = [8, 128], strides = [1, 1]} : vector<8x512xf32> to vector<8x128xf32>
    %244 = arith.negf %243 : vector<8x128xf32>
    %245 = math.exp %244 : vector<8x128xf32>
    %cst_61 = arith.constant 1.000000e+00 : f32
    %246 = vector.broadcast %cst_61 : f32 to vector<8x128xf32>
    %247 = arith.addf %246, %245 : vector<8x128xf32>
    %248 = arith.divf %246, %247 : vector<8x128xf32>
    %249 = vector.extract_strided_slice %236 {offsets = [0, 256], sizes = [8, 128], strides = [1, 1]} : vector<8x512xf32> to vector<8x128xf32>
    %250 = math.tanh %249 : vector<8x128xf32>
    %251 = vector.extract_strided_slice %236 {offsets = [0, 384], sizes = [8, 128], strides = [1, 1]} : vector<8x512xf32> to vector<8x128xf32>
    %252 = arith.negf %251 : vector<8x128xf32>
    %253 = math.exp %252 : vector<8x128xf32>
    %cst_62 = arith.constant 1.000000e+00 : f32
    %254 = vector.broadcast %cst_62 : f32 to vector<8x128xf32>
    %255 = arith.addf %254, %253 : vector<8x128xf32>
    %256 = arith.divf %254, %255 : vector<8x128xf32>
    %257 = arith.mulf %248, %228 : vector<8x128xf32>
    %258 = arith.mulf %242, %250 : vector<8x128xf32>
    %259 = arith.addf %257, %258 : vector<8x128xf32>
    %260 = math.tanh %259 : vector<8x128xf32>
    %261 = arith.mulf %256, %260 : vector<8x128xf32>
    %c8_i32_63 = arith.constant 8 : i32
    %c0_64 = arith.constant 0 : index
    %c0_65 = arith.constant 0 : index
    %262 = vector.load %arg9[%c0_64, %c0_65] : memref<8x128xf32, #tpu.memory_space<vmem>>, vector<8x128xf32>
    tpu.vector_store %arg9[%c0_64, %c0_65], %261 {strides = array<i32>} : memref<8x128xf32, #tpu.memory_space<vmem>>, vector<8x128xf32>,
    %c0_66 = arith.constant 0 : index
    %c0_67 = arith.constant 0 : index
    %263 = vector.load %arg10[%c0_66, %c0_67] : memref<8x128xf32, #tpu.memory_space<vmem>>, vector<8x128xf32>
    tpu.vector_store %arg10[%c0_66, %c0_67], %259 {strides = array<i32>} : memref<8x128xf32, #tpu.memory_space<vmem>>, vector<8x128xf32>,
    %c0_i32_68 = arith.constant 0 : i32
    %264 = arith.cmpi eq, %arg1, %c0_i32_68 : i32
    %265 = arith.extui %264 : i1 to i32
    %c0_i32_69 = arith.constant 0 : i32
    %266 = arith.cmpi ne, %265, %c0_i32_69 : i32
    scf.if %266 {
      %c0_70 = arith.constant 0 : index
      %c0_71 = arith.constant 0 : index
      %267 = vector.load %arg9[%c0_70, %c0_71] : memref<8x128xf32, #tpu.memory_space<vmem>>, vector<8x128xf32>
      %268 = arith.truncf %267 : vector<8x128xf32> to vector<8x128xbf16>
      %c0_72 = arith.constant 0 : index
      %c0_73 = arith.constant 0 : index
      %269 = vector.load %arg6[%c0_72, %c0_73] : memref<128x128xbf16, #tpu.memory_space<vmem>>, vector<128x128xbf16>
      %cst_74 = arith.constant dense<0.000000e+00> : vector<8x128xf32>
      %270 = tpu.matmul %268, %269, %cst_74 {dimension_numbers = #tpu.dot_dimension_numbers<[1], [0], [0], [1], [0, 0, 1, 1], [], []>} : vector<8x128xbf16>, vector<128x128xbf16>, vector<8x128xf32> -> vector<8x128xf32>
      %c0_75 = arith.constant 0 : index
      %c0_76 = arith.constant 0 : index
      %271 = vector.load %arg7[%c0_75, %c0_76] : memref<1x128xf32, #tpu.memory_space<vmem>>, vector<1x128xf32>
      %272 = vector.broadcast %271 : vector<1x128xf32> to vector<8x128xf32>
      %273 = arith.addf %270, %272 : vector<8x128xf32>
      %c0_77 = arith.constant 0 : index
      %c0_78 = arith.constant 0 : index
      %274 = vector.load %arg8[%c0_77, %c0_78] : memref<8x128xf32, #tpu.memory_space<vmem>>, vector<8x128xf32>
      tpu.vector_store %arg8[%c0_77, %c0_78], %273 {strides = array<i32>} : memref<8x128xf32, #tpu.memory_space<vmem>>, vector<8x128xf32>,
    } else {
    }
    return
  }
  func.func @transform_0(%arg0: i32, %arg1: i32) -> (i32, i32, i32) {
    %c0_i32 = arith.constant 0 : i32
    %c0_i32_0 = arith.constant 0 : i32
    return %arg0, %arg1, %c0_i32 : i32, i32, i32
  }
  func.func @transform_1(%arg0: i32, %arg1: i32) -> (i32, i32) {
    %c0_i32 = arith.constant 0 : i32
    %c0_i32_0 = arith.constant 0 : i32
    %c0_i32_1 = arith.constant 0 : i32
    return %c0_i32, %c0_i32_0 : i32, i32
  }
  func.func @transform_2(%arg0: i32, %arg1: i32) -> (i32, i32) {
    %c0_i32 = arith.constant 0 : i32
    %c0_i32_0 = arith.constant 0 : i32
    %c0_i32_1 = arith.constant 0 : i32
    return %c0_i32, %c0_i32_0 : i32, i32
  }
  func.func @transform_3(%arg0: i32, %arg1: i32) -> (i32, i32) {
    %c0_i32 = arith.constant 0 : i32
    %c0_i32_0 = arith.constant 0 : i32
    %c0_i32_1 = arith.constant 0 : i32
    return %c0_i32, %c0_i32_0 : i32, i32
  }
  func.func @transform_4(%arg0: i32, %arg1: i32) -> (i32, i32) {
    %c0_i32 = arith.constant 0 : i32
    %c0_i32_0 = arith.constant 0 : i32
    %c0_i32_1 = arith.constant 0 : i32
    return %c0_i32, %c0_i32_0 : i32, i32
  }
  func.func @transform_5(%arg0: i32, %arg1: i32) -> (i32, i32) {
    %c0_i32 = arith.constant 0 : i32
    %c0_i32_0 = arith.constant 0 : i32
    %c0_i32_1 = arith.constant 0 : i32
    return %c0_i32, %c0_i32_0 : i32, i32
  }
  func.func @transform_6(%arg0: i32, %arg1: i32) -> (i32, i32) {
    %c0_i32 = arith.constant 0 : i32
    %c0_i32_0 = arith.constant 0 : i32
    return %arg0, %c0_i32 : i32, i32
  }
}

</mosaic_0001>

<bundles_post_ra>
// kernel: tpu_custom_call.1
= control target key start
LH: loop header
LB: loop body
LE: loop exit
PB: predicated region body
PF: predicated region fallthrough
CT: control target
= control target key end

     0   :  { %11 = vsyncpa [#allocation6], 0  ;;  %s2876_s0 = inlined_call_operand.hbm [shape: bf16[1,64,128], index: 0, kind: input, shape index: {}]   ;;  %s2877_s1 = inlined_call_operand.hbm [shape: bf16[128,512], index: 1, kind: input, shape index: {}]   ;;  %s2878_s2 = inlined_call_operand.hbm [shape: bf16[128,512], index: 2, kind: input, shape index: {}]   ;;  %s2879_s3 = inlined_call_operand.vmem [shape: f32[1,512], index: 3, kind: input, shape index: {}]   ;;  %s2880_s4 = inlined_call_operand.hbm [shape: bf16[128,128], index: 4, kind: input, shape index: {}]   ;;  %s2881_s5 = inlined_call_operand.vmem [shape: f32[1,128], index: 5, kind: input, shape index: {}]   ;;  %s2882_s6 = inlined_call_operand.hbm [shape: f32[8,128], index: 6, kind: output, shape index: {}]  }
   0x1   :  { %12 = vsyncpa [#allocation9], 0 }
   0x2   :  { %13 = vsyncpa [#allocation12], 0 }
   0x3   :  { %14 = vsyncpa [#allocation7], 0  ;;  %s2279_s21 = smov [#allocation8]  }
   0x4   :  { %s32_s22 = sshll.u32 %s2279_s21, 4  ;;  %s33_s22 = int_to_ptr.vmem [resolvable:$true] %s32_s22 }
   0x5   :  { %s2179_s23 = scalar_lea.vmem %s33_s22, 4096  ;;  %p2184_p1 = scmp.lt.s32.totalorder %s33_s22, %s33_s22 }
   0x6   :  { %p2180_p0 = scmp.ne.s32.totalorder %s33_s22, %s2179_s23  ;;  %p2185_p2 = scmp.lt.s32.totalorder %s2179_s23, %s2179_s23 }
   0x8   :  { %p2186_p3 = por %p2185_p2, %p2184_p1 }
   0xa   :  { %p2187_p4 = pnand %p2186_p3, %p2180_p0 }
   0xc   :  { %2190 = shalt.err (!%p2187_p4)
}
   0xd   :  { %s2280_s24 = smov 256   ;;  %s2281_s25 = smov 16  }
   0xe   :  { %38 = dma.hbm_to_vmem [thread:$0]  %s2877_s1, 4096, %s33_s22, [#allocation9], %s2280_s24, %s2280_s24, %s2281_s25  }
   0xf   :  { %s2282_s28 = smov [#allocation5]  }
  0x10   :  { %s20_s29 = sshll.u32 %s2282_s28, 4  ;;  %s21_s29 = int_to_ptr.vmem [resolvable:$true] %s20_s29 }
  0x11   :  { %s2199_s30 = scalar_lea.vmem %s21_s29, 512  ;;  %p2204_p6 = scmp.lt.s32.totalorder %s21_s29, %s21_s29 }
  0x12   :  { %p2200_p5 = scmp.ne.s32.totalorder %s21_s29, %s2199_s30  ;;  %p2205_p7 = scmp.lt.s32.totalorder %s2199_s30, %s2199_s30 }
  0x14   :  { %p2206_p8 = por %p2205_p7, %p2204_p6 }
  0x16   :  { %p2207_p9 = pnand %p2206_p8, %p2200_p5 }
  0x18   :  { %2210 = shalt.err (!%p2207_p9)
}
  0x19   :  { %s2283_s7 = smov 64   ;;  %s2284_s8 = smov 4  }
  0x1a   :  { %26 = dma.hbm_to_vmem [thread:$0]  %s2876_s0, 512, %s21_s29, [#allocation6], %s2283_s7, %s2283_s7, %s2284_s8  }
  0x1b   :  { %s2285_s11 = smov [#allocation10]   ;;  %s2286_s13 = smov [#allocation11]  }
  0x1c   :  { %s44_s12 = sshll.u32 %s2285_s11, 4  ;;  %s58_s1 = sshll.u32 %s2286_s13, 4  ;;  %s45_s12 = int_to_ptr.vmem [resolvable:$true] %s44_s12  ;;  %s59_s1 = int_to_ptr.vmem [resolvable:$true] %s58_s1 }
  0x1d   :  { %s2219_s14 = scalar_lea.vmem %s45_s12, 4096  ;;  %p2224_p11 = scmp.lt.s32.totalorder %s45_s12, %s45_s12 }
  0x1e   :  { %p2220_p10 = scmp.ne.s32.totalorder %s45_s12, %s2219_s14  ;;  %p2225_p12 = scmp.lt.s32.totalorder %s2219_s14, %s2219_s14 }
  0x20   :  { %p2226_p13 = por %p2225_p12, %p2224_p11 }
  0x22   :  { %p2227_p0 = pnand %p2226_p13, %p2220_p10 }
  0x24   :  { %2230 = shalt.err (!%p2227_p0)
}
  0x25   :  { %50 = dma.hbm_to_vmem [thread:$0]  %s2878_s2, 4096, %s45_s12, [#allocation9], %s2280_s24, %s2280_s24, %s2281_s25  }
  0x26   :  { %s2239_s0 = scalar_lea.vmem %s59_s1, 1024  ;;  %p2244_p2 = scmp.lt.s32.totalorder %s59_s1, %s59_s1 }
  0x27   :  { %p2240_p1 = scmp.ne.s32.totalorder %s59_s1, %s2239_s0  ;;  %p2245_p3 = scmp.lt.s32.totalorder %s2239_s0, %s2239_s0 }
  0x29   :  { %p2246_p4 = por %p2245_p3, %p2244_p2 }
  0x2b   :  { %p2247_p5 = pnand %p2246_p4, %p2240_p1 }
  0x2d   :  { %2250 = shalt.err (!%p2247_p5)
}
  0x2e   :  { %64 = dma.hbm_to_vmem [thread:$0]  %s2880_s4, 1024, %s59_s1, [#allocation12], %s2283_s7, %s2283_s7, %s2284_s8  }
  0x2f   :  { %2271 = dma.done.wait [#allocation6], 512  }
  0x30   :  { %2272 = vsyncadd [#allocation6], 4294966784 }
  0x31   :  { %2273 = dma.done.wait [#allocation9], 8192  }
  0x32   :  { %2274 = vsyncadd [#allocation9], 4294959104 }
  0x33   :  { %2275 = dma.done.wait [#allocation12], 1024  }
  0x34   :  { %2276 = vsyncadd [#allocation12], 4294966272  ;;  %v2883_v0 = vmov 0   ;;  %v1903_v1 = vld [vmem:[#allocation8 + $0xe4] ss:$16 sps:$4 sm:$0xff]   ;;  %v1964_v44 = vld [vmem:[#allocation5 + $0x8] sm:$0xff]  }
  0x35   :  { %364 = vmatprep.mubr.bf16.mxu0 %v2883_v0  ;;  %437 = vmatprep.mubr.bf16.mxu1 %v2883_v0  ;;  %v1905_v2 = vld [vmem:[#allocation8 + $0xec] ss:$16 sps:$4 sm:$0xff]   ;;  %v1907_v3 = vld [vmem:[#allocation8 + $0xe0] ss:$16 sps:$4 sm:$0xff]   ;;  %v1908_v4 = vld [vmem:[#allocation8 + $0xe8] ss:$16 sps:$4 sm:$0xff]  }
  0x36   :  { %332 = vmatprep.subr.bf16.mxu0 %v1903_v1  ;;  %405 = vmatprep.subr.bf16.mxu1 %v1905_v2  ;;  %v1909_v5 = vld [vmem:[#allocation8 + $0xc4] ss:$16 sps:$4 sm:$0xff]   ;;  %v1911_v6 = vld [vmem:[#allocation8 + $0xcc] ss:$16 sps:$4 sm:$0xff]   ;;  %v1913_v7 = vld [vmem:[#allocation8 + $0xc0] ss:$16 sps:$4 sm:$0xff]  }
  0x37   :  { %333 = vmatpush1.bf16.msra.mxu0 %v1907_v3  ;;  %406 = vmatpush1.bf16.msra.mxu1 %v1908_v4  ;;  %v1914_v8 = vld [vmem:[#allocation8 + $0xc8] ss:$16 sps:$4 sm:$0xff]   ;;  %v1915_v9 = vld [vmem:[#allocation8 + $0xa4] ss:$16 sps:$4 sm:$0xff]   ;;  %v1917_v10 = vld [vmem:[#allocation8 + $0xac] ss:$16 sps:$4 sm:$0xff]  }
  0x38   :  { %334 = vmatprep.subr.bf16.mxu0 %v1909_v5  ;;  %407 = vmatprep.subr.bf16.mxu1 %v1911_v6  ;;  %v1919_v11 = vld [vmem:[#allocation8 + $0xa0] ss:$16 sps:$4 sm:$0xff]   ;;  %v1920_v12 = vld [vmem:[#allocation8 + $0xa8] ss:$16 sps:$4 sm:$0xff]   ;;  %v1921_v13 = vld [vmem:[#allocation8 + $0x84] ss:$16 sps:$4 sm:$0xff]  }
  0x39   :  { %v1923_v14 = vld [vmem:[#allocation8 + $0x8c] ss:$16 sps:$4 sm:$0xff]   ;;  %v1925_v15 = vld [vmem:[#allocation8 + $0x80] ss:$16 sps:$4 sm:$0xff]   ;;  %v1926_v16 = vld [vmem:[#allocation8 + $0x88] ss:$16 sps:$4 sm:$0xff]  }
  0x3a   :  { %v1927_v17 = vld [vmem:[#allocation8 + $0x64] ss:$16 sps:$4 sm:$0xff]   ;;  %v1929_v18 = vld [vmem:[#allocation8 + $0x6c] ss:$16 sps:$4 sm:$0xff]   ;;  %v1931_v19 = vld [vmem:[#allocation8 + $0x60] ss:$16 sps:$4 sm:$0xff]  }
  0x3b   :  { %335 = vmatpush1.bf16.msra.mxu0 %v1913_v7  ;;  %408 = vmatpush1.bf16.msra.mxu1 %v1914_v8  ;;  %v1932_v20 = vld [vmem:[#allocation8 + $0x68] ss:$16 sps:$4 sm:$0xff]   ;;  %v1933_v21 = vld [vmem:[#allocation8 + $0x44] ss:$16 sps:$4 sm:$0xff]   ;;  %v1935_v22 = vld [vmem:[#allocation8 + $0x4c] ss:$16 sps:$4 sm:$0xff]   ;;  %v128_v7 = vlaneseq }
  0x3c   :  { %336 = vmatprep.subr.bf16.mxu0 %v1915_v9  ;;  %409 = vmatprep.subr.bf16.mxu1 %v1917_v10  ;;  %v1937_v23 = vld [vmem:[#allocation8 + $0x40] ss:$16 sps:$4 sm:$0xff]   ;;  %v1938_v24 = vld [vmem:[#allocation8 + $0x48] ss:$16 sps:$4 sm:$0xff]   ;;  %v1939_v25 = vld [vmem:[#allocation8 + $0x24] ss:$16 sps:$4 sm:$0xff]  }
  0x3d   :  { %v1941_v26 = vld [vmem:[#allocation8 + $0x2c] ss:$16 sps:$4 sm:$0xff]   ;;  %v1943_v27 = vld [vmem:[#allocation8 + $0x20] ss:$16 sps:$4 sm:$0xff]   ;;  %v1944_v28 = vld [vmem:[#allocation8 + $0x28] ss:$16 sps:$4 sm:$0xff]  }
  0x3e   :  { %v1945_v29 = vld [vmem:[#allocation8 + $0x4] ss:$16 sps:$4 sm:$0xff]   ;;  %v1947_v30 = vld [vmem:[#allocation8 + $0xc] ss:$16 sps:$4 sm:$0xff]   ;;  %v1949_v31 = vld [vmem:[#allocation8] ss:$16 sps:$4 sm:$0xff]  }
  0x3f   :  { %337 = vmatpush1.bf16.msra.mxu0 %v1919_v11  ;;  %410 = vmatpush1.bf16.msra.mxu1 %v1920_v12  ;;  %v1950_v32 = vld [vmem:[#allocation8 + $0x8] ss:$16 sps:$4 sm:$0xff]   ;;  %v2347_v33 = vld [vmem:[#allocation10 + $0xe4] ss:$16 sps:$4 sm:$0xff]   ;;  %v2349_v34 = vld [vmem:[#allocation10 + $0xec] ss:$16 sps:$4 sm:$0xff]  }
  0x40   :  { %338 = vmatprep.subr.bf16.mxu0 %v1921_v13  ;;  %411 = vmatprep.subr.bf16.mxu1 %v1923_v14  ;;  %v1951_v35 = vld [vmem:[#allocation5] sm:$0xff]   ;;  %v2353_v37 = vld [vmem:[#allocation10 + $0xe8] ss:$16 sps:$4 sm:$0xff]   ;;  %v2359_v39 = vld [vmem:[#allocation10 + $0xcc] ss:$16 sps:$4 sm:$0xff]   ;;  %v2288_v6 = vmov 0.0|0.0  }
  0x41   :  { %v2351_v36 = vld [vmem:[#allocation10 + $0xe0] ss:$16 sps:$4 sm:$0xff]   ;;  %v2357_v38 = vld [vmem:[#allocation10 + $0xc4] ss:$16 sps:$4 sm:$0xff]   ;;  %v2365_v41 = vld [vmem:[#allocation10 + $0xc8] ss:$16 sps:$4 sm:$0xff]  }
  0x42   :  { %v2361_v40 = vld [vmem:[#allocation10 + $0xc0] ss:$16 sps:$4 sm:$0xff]   ;;  %v2369_v42 = vld [vmem:[#allocation10 + $0xa4] ss:$16 sps:$4 sm:$0xff]   ;;  %v2371_v43 = vld [vmem:[#allocation10 + $0xac] ss:$16 sps:$4 sm:$0xff]  }
  0x43   :  { %339 = vmatpush1.bf16.msra.mxu0 %v1925_v15  ;;  %412 = vmatpush1.bf16.msra.mxu1 %v1926_v16  ;;  %v2375_v45 = vld [vmem:[#allocation10 + $0xa0] ss:$16 sps:$4 sm:$0xff]   ;;  %v2377_v46 = vld [vmem:[#allocation10 + $0xa8] ss:$16 sps:$4 sm:$0xff]   ;;  %v2381_v47 = vld [vmem:[#allocation10 + $0x84] ss:$16 sps:$4 sm:$0xff]  }
  0x44   :  { %340 = vmatprep.subr.bf16.mxu0 %v1927_v17  ;;  %413 = vmatprep.subr.bf16.mxu1 %v1929_v18  ;;  %v2385_v48 = vld [vmem:[#allocation10 + $0x8c] ss:$16 sps:$4 sm:$0xff]   ;;  %v2387_v49 = vld [vmem:[#allocation10 + $0x80] ss:$16 sps:$4 sm:$0xff]   ;;  %v2389_v50 = vld [vmem:[#allocation10 + $0x88] ss:$16 sps:$4 sm:$0xff]  }
  0x45   :  { %v2393_v51 = vld [vmem:[#allocation10 + $0x64] ss:$16 sps:$4 sm:$0xff]   ;;  %v2397_v52 = vld [vmem:[#allocation10 + $0x6c] ss:$16 sps:$4 sm:$0xff]   ;;  %v2401_v54 = vld [vmem:[#allocation10 + $0x60] ss:$16 sps:$4 sm:$0xff]  }
  0x46   :  { %v1977_v53 = vld [vmem:[#allocation5 + $0x10] sm:$0xff]   ;;  %v2403_v55 = vld [vmem:[#allocation10 + $0x68] ss:$16 sps:$4 sm:$0xff]   ;;  %v2407_v57 = vld [vmem:[#allocation10 + $0x4c] ss:$16 sps:$4 sm:$0xff]   ;;  %v129_v8 = vshrl.u32 %v128_v7, 7 }
  0x47   :  { %341 = vmatpush1.bf16.msra.mxu0 %v1931_v19  ;;  %414 = vmatpush1.bf16.msra.mxu1 %v1932_v20  ;;  %v2405_v56 = vld [vmem:[#allocation10 + $0x44] ss:$16 sps:$4 sm:$0xff]   ;;  %v2415_v58 = vld [vmem:[#allocation10 + $0x40] ss:$16 sps:$4 sm:$0xff]   ;;  %v2417_v59 = vld [vmem:[#allocation10 + $0x48] ss:$16 sps:$4 sm:$0xff]  }
  0x48   :  { %342 = vmatprep.subr.bf16.mxu0 %v1933_v21  ;;  %415 = vmatprep.subr.bf16.mxu1 %v1935_v22  ;;  %v2421_v60 = vld [vmem:[#allocation10 + $0x24] ss:$16 sps:$4 sm:$0xff]   ;;  %v2423_v61 = vld [vmem:[#allocation10 + $0x2c] ss:$16 sps:$4 sm:$0xff]   ;;  %v2429_v63 = vld [vmem:[#allocation10 + $0x20] ss:$16 sps:$4 sm:$0xff]  }
  0x49   :  { %v1990_v62 = vld [vmem:[#allocation5 + $0x18] sm:$0xff]   ;;  %v2435_v2 = vld [vmem:[#allocation10 + $0x4] ss:$16 sps:$4 sm:$0xff]   ;;  %v2441_v4 = vld [vmem:[#allocation10] ss:$16 sps:$4 sm:$0xff]   ;;  %v138_v9 = vsub.s32 2, %v129_v8 }
  0x4a   :  { %v2431_v1 = vld [vmem:[#allocation10 + $0x28] ss:$16 sps:$4 sm:$0xff]   ;;  %v2437_v3 = vld [vmem:[#allocation10 + $0xc] ss:$16 sps:$4 sm:$0xff]   ;;  %v130_v10 = vsub.s32 0, %v129_v8  ;;  %v142_v11 = vsub.s32 3, %v129_v8 }
  0x4b   :  { %343 = vmatpush1.bf16.msra.mxu0 %v1937_v23  ;;  %416 = vmatpush1.bf16.msra.mxu1 %v1938_v24  ;;  %v2443_v5 = vld [vmem:[#allocation10 + $0x8] ss:$16 sps:$4 sm:$0xff]   ;;  %v126_v12 = vld [vmem:[%s2879_s3] sm:$0xf]  ;;  %v134_v16 = vsub.s32 1, %v129_v8  ;;  %vm2290_vm0 = vmmov 0  }
  0x4c   :  { %344 = vmatprep.subr.bf16.mxu0 %v1939_v25  ;;  %417 = vmatprep.subr.bf16.mxu1 %v1941_v26  ;;  %v2494_v15 = vrot.slane %v126_v12, %v138_v9  ;;  %v131_v19 = vrot.slane %v126_v12, %v130_v10  ;;  %v2500_v20 = vrot.slane %v126_v12, %v142_v11  ;;  %s2291_s20 = smov [#allocation13]  }
  0x4d   :  { %v135_v23 = vrot.slane %v126_v12, %v134_v16  ;;  %s1749_s21 = sshll.u32 %s2291_s20, 4  ;;  %s1750_s21 = int_to_ptr.vmem [resolvable:$true] %s1749_s21 }
  0x4e   :  { %s2251_s22 = scalar_lea.vmem %s1750_s21, 128  ;;  %p2256_p7 = scmp.lt.s32.totalorder %s1750_s21, %s1750_s21 }
  0x4f   :  { %345 = vmatpush1.bf16.msra.mxu0 %v1943_v27  ;;  %418 = vmatpush1.bf16.msra.mxu1 %v1944_v28  ;;  %p2252_p6 = scmp.ne.s32.totalorder %s1750_s21, %s2251_s22  ;;  %p2257_p8 = scmp.lt.s32.totalorder %s2251_s22, %s2251_s22 }
  0x50   :  { %346 = vmatprep.subr.bf16.mxu0 %v1945_v29  ;;  %419 = vmatprep.subr.bf16.mxu1 %v1947_v30 }
  0x51   :  { %p2258_p9 = por %p2257_p8, %p2256_p7 }
  0x53   :  { %347 = vmatpush1.bf16.msra.mxu0 %v1949_v31  ;;  %420 = vmatpush1.bf16.msra.mxu1 %v1950_v32  ;;  %p2259_p10 = pnand %p2258_p9, %p2252_p6 }
  0x54   :  { %709 = vmatprep.subr.bf16.mxu0 %v2347_v33  ;;  %750 = vmatprep.subr.bf16.mxu1 %v2349_v34 }
  0x56   :  { %365 = vmatmul.mubr.bf16.vlgmr.msra.gmra.mxu0 %v1951_v35  ;;  %438 = vmatmul.mubr.bf16.vlgmr.msra.gmra.mxu1 %v1951_v35 }
  0x57   :  { %710 = vmatpush1.bf16.msra.mxu0 %v2351_v36  ;;  %751 = vmatpush1.bf16.msra.mxu1 %v2353_v37 }
  0x58   :  { %711 = vmatprep.subr.bf16.mxu0 %v2357_v38  ;;  %752 = vmatprep.subr.bf16.mxu1 %v2359_v39 }
  0x59   :  { %374 = vmatprep.mubr.bf16.mxu0 %v2883_v0  ;;  %447 = vmatprep.mubr.bf16.mxu1 %v2883_v0 }
  0x5b   :  { %712 = vmatpush1.bf16.msra.mxu0 %v2361_v40  ;;  %753 = vmatpush1.bf16.msra.mxu1 %v2365_v41 }
  0x5c   :  { %713 = vmatprep.subr.bf16.mxu0 %v2369_v42  ;;  %754 = vmatprep.subr.bf16.mxu1 %v2371_v43 }
  0x5e   :  { %375 = vmatmul.mubr.bf16.gmra.mxu0 %v1964_v44  ;;  %448 = vmatmul.mubr.bf16.gmra.mxu1 %v1964_v44 }
  0x5f   :  { %714 = vmatpush1.bf16.msra.mxu0 %v2375_v45  ;;  %755 = vmatpush1.bf16.msra.mxu1 %v2377_v46 }
  0x60   :  { %715 = vmatprep.subr.bf16.mxu0 %v2381_v47  ;;  %756 = vmatprep.subr.bf16.mxu1 %v2385_v48 }
  0x61   :  { %384 = vmatprep.mubr.bf16.mxu0 %v2883_v0  ;;  %457 = vmatprep.mubr.bf16.mxu1 %v2883_v0 }
  0x63   :  { %716 = vmatpush1.bf16.msra.mxu0 %v2387_v49  ;;  %757 = vmatpush1.bf16.msra.mxu1 %v2389_v50 }
  0x64   :  { %717 = vmatprep.subr.bf16.mxu0 %v2393_v51  ;;  %758 = vmatprep.subr.bf16.mxu1 %v2397_v52 }
  0x66   :  { %385 = vmatmul.mubr.bf16.gmra.mxu0 %v1977_v53  ;;  %458 = vmatmul.mubr.bf16.gmra.mxu1 %v1977_v53 }
  0x67   :  { %718 = vmatpush1.bf16.msra.mxu0 %v2401_v54  ;;  %759 = vmatpush1.bf16.msra.mxu1 %v2403_v55 }
  0x68   :  { %719 = vmatprep.subr.bf16.mxu0 %v2405_v56  ;;  %760 = vmatprep.subr.bf16.mxu1 %v2407_v57 }
  0x69   :  { %394 = vmatprep.mubr.bf16.mxu0 %v2883_v0  ;;  %467 = vmatprep.mubr.bf16.mxu1 %v2883_v0 }
  0x6b   :  { %720 = vmatpush1.bf16.msra.mxu0 %v2415_v58  ;;  %761 = vmatpush1.bf16.msra.mxu1 %v2417_v59 }
  0x6c   :  { %721 = vmatprep.subr.bf16.mxu0 %v2421_v60  ;;  %762 = vmatprep.subr.bf16.mxu1 %v2423_v61 }
  0x6e   :  { %395 = vmatmul.mubr.bf16.gmra.mxu0 %v1990_v62  ;;  %468 = vmatmul.mubr.bf16.gmra.mxu1 %v1990_v62 }
  0x6f   :  { %722 = vmatpush1.bf16.msra.mxu0 %v2429_v63  ;;  %763 = vmatpush1.bf16.msra.mxu1 %v2431_v1 }
  0x70   :  { %723 = vmatprep.subr.bf16.mxu0 %v2435_v2  ;;  %764 = vmatprep.subr.bf16.mxu1 %v2437_v3 }
  0x71   :  { %741 = vmatprep.mubr.bf16.mxu0 %v2883_v0  ;;  %782 = vmatprep.mubr.bf16.mxu1 %v2883_v0 }
  0x73   :  { %724 = vmatpush1.bf16.msra.mxu0 %v2441_v4  ;;  %765 = vmatpush1.bf16.msra.mxu1 %v2443_v5 }
  0x74   :  { %824 = vmatprep.subr.bf16.mxu0 %v2347_v33  ;;  %865 = vmatprep.subr.bf16.mxu1 %v2349_v34 }
  0x76   :  { %742 = vmatmul.mubr.bf16.vlgmr.msra.gmra.mxu0 %v2288_v6  ;;  %783 = vmatmul.mubr.bf16.vlgmr.msra.gmra.mxu1 %v2288_v6 }
  0x77   :  { %825 = vmatpush1.bf16.msra.mxu0 %v2351_v36  ;;  %866 = vmatpush1.bf16.msra.mxu1 %v2353_v37 }
  0x78   :  { %826 = vmatprep.subr.bf16.mxu0 %v2357_v38  ;;  %867 = vmatprep.subr.bf16.mxu1 %v2359_v39 }
  0x79   :  { %856 = vmatprep.mubr.bf16.mxu0 %v2883_v0  ;;  %897 = vmatprep.mubr.bf16.mxu1 %v2883_v0 }
  0x7b   :  { %827 = vmatpush1.bf16.msra.mxu0 %v2361_v40  ;;  %868 = vmatpush1.bf16.msra.mxu1 %v2365_v41 }
  0x7c   :  { %828 = vmatprep.subr.bf16.mxu0 %v2369_v42  ;;  %869 = vmatprep.subr.bf16.mxu1 %v2371_v43 }
  0x7f   :  { %829 = vmatpush1.bf16.msra.mxu0 %v2375_v45  ;;  %870 = vmatpush1.bf16.msra.mxu1 %v2377_v46 }
  0x80   :  { %830 = vmatprep.subr.bf16.mxu0 %v2381_v47  ;;  %871 = vmatprep.subr.bf16.mxu1 %v2385_v48 }
  0x83   :  { %831 = vmatpush1.bf16.msra.mxu0 %v2387_v49  ;;  %872 = vmatpush1.bf16.msra.mxu1 %v2389_v50 }
  0x84   :  { %832 = vmatprep.subr.bf16.mxu0 %v2393_v51  ;;  %873 = vmatprep.subr.bf16.mxu1 %v2397_v52 }
  0x87   :  { %833 = vmatpush1.bf16.msra.mxu0 %v2401_v54  ;;  %874 = vmatpush1.bf16.msra.mxu1 %v2403_v55 }
  0x88   :  { %834 = vmatprep.subr.bf16.mxu0 %v2405_v56  ;;  %875 = vmatprep.subr.bf16.mxu1 %v2407_v57 }
  0x8b   :  { %835 = vmatpush1.bf16.msra.mxu0 %v2415_v58  ;;  %876 = vmatpush1.bf16.msra.mxu1 %v2417_v59 }
  0x8c   :  { %836 = vmatprep.subr.bf16.mxu0 %v2421_v60  ;;  %877 = vmatprep.subr.bf16.mxu1 %v2423_v61 }
  0x8f   :  { %837 = vmatpush1.bf16.msra.mxu0 %v2429_v63  ;;  %878 = vmatpush1.bf16.msra.mxu1 %v2431_v1 }
  0x90   :  { %838 = vmatprep.subr.bf16.mxu0 %v2435_v2  ;;  %879 = vmatprep.subr.bf16.mxu1 %v2437_v3 }
  0x93   :  { %839 = vmatpush1.bf16.msra.mxu0 %v2441_v4  ;;  %880 = vmatpush1.bf16.msra.mxu1 %v2443_v5 }
  0x94   :  { %939 = vmatprep.subr.bf16.mxu0 %v2347_v33  ;;  %980 = vmatprep.subr.bf16.mxu1 %v2349_v34 }
 0x116   :  { %v2490_v13 = vpop.f32.mrf.mxu0  ;;  %v2492_v14 = vpop.f32.mrf.mxu1 }
 0x118   :  { %v2496_v17 = vpop.f32.mrf.mxu0  ;;  %v2498_v18 = vpop.f32.mrf.mxu1 }
 0x11a   :  { %v370_v21 = vpop.f32.mrf.mxu0  ;;  %v443_v22 = vpop.f32.mrf.mxu1 }
 0x11b   :  { %v2502_v24 = vadd.f32 %v370_v21, %v131_v19  ;;  %v2505_v25 = vadd.f32 %v443_v22, %v2494_v15 }
 0x11c   :  { %v372_v26 = vpop.f32.mrf.mxu0  ;;  %v445_v27 = vpop.f32.mrf.mxu1 }
 0x11d   :  { %v2507_v28 = vadd.f32 %v372_v26, %v135_v23  ;;  %v2510_v29 = vadd.f32 %v445_v27, %v2500_v20 }
 0x11e   :  { %v376_v30 = vpop.f32.mrf.mxu0  ;;  %v449_v31 = vpop.f32.mrf.mxu1 }
 0x11f   :  { %v2512_v32 = vadd.f32 %v376_v30, %v131_v19  ;;  %v2515_v35 = vadd.f32 %v449_v31, %v2494_v15 }
 0x120   :  { %v378_v44 = vpop.f32.mrf.mxu0  ;;  %v451_v53 = vpop.f32.mrf.mxu1 }
 0x121   :  { %2885 = vst [vmem:[#allocation18_spill] sm:$0xff] %v2515_v35  ;;  %v2517_v62 = vadd.f32 %v378_v44, %v135_v23  ;;  %v2520_v6 = vadd.f32 %v451_v53, %v2500_v20 }
 0x122   :  { %v380_v7 = vpop.f32.mrf.mxu0  ;;  %v453_v8 = vpop.f32.mrf.mxu1 }
 0x123   :  { %v2522_v9 = vadd.f32 %v380_v7, %v131_v19  ;;  %v2525_v10 = vadd.f32 %v453_v8, %v2494_v15 }
 0x124   :  { %v382_v11 = vpop.f32.mrf.mxu0  ;;  %v455_v12 = vpop.f32.mrf.mxu1 }
 0x125   :  { %2886 = vst [vmem:[#allocation19_spill] sm:$0xff] %v2522_v9  ;;  %2887 = vst [vmem:[#allocation20_spill] sm:$0xff] %v2525_v10  ;;  %v2527_v16 = vadd.f32 %v382_v11, %v135_v23  ;;  %v2530_v21 = vadd.f32 %v455_v12, %v2500_v20 }
 0x126   :  { %v386_v22 = vpop.f32.mrf.mxu0  ;;  %v459_v26 = vpop.f32.mrf.mxu1 }
 0x127   :  { %2888 = vst [vmem:[#allocation21_spill] sm:$0xff] %v2527_v16  ;;  %2889 = vst [vmem:[#allocation22_spill] sm:$0xff] %v2530_v21  ;;  %v2532_v27 = vadd.f32 %v386_v22, %v131_v19  ;;  %v2535_v30 = vadd.f32 %v459_v26, %v2494_v15 }
 0x128   :  { %v388_v31 = vpop.f32.mrf.mxu0  ;;  %v461_v44 = vpop.f32.mrf.mxu1 }
 0x129   :  { %2890 = vst [vmem:[#allocation23_spill] sm:$0xff] %v2532_v27  ;;  %2891 = vst [vmem:[#allocation24_spill] sm:$0xff] %v2535_v30  ;;  %v2537_v53 = vadd.f32 %v388_v31, %v135_v23  ;;  %v2540_v7 = vadd.f32 %v461_v44, %v2500_v20 }
 0x12a   :  { %v390_v8 = vpop.f32.mrf.mxu0  ;;  %v463_v11 = vpop.f32.mrf.mxu1 }
 0x12b   :  { %2892 = vst [vmem:[#allocation25_spill] sm:$0xff] %v2537_v53  ;;  %2893 = vst [vmem:[#allocation26_spill] sm:$0xff] %v2540_v7  ;;  %v2542_v0 = vadd.f32 %v390_v8, %v131_v19  ;;  %v2545_v12 = vadd.f32 %v463_v11, %v2494_v15 }
 0x12c   :  { %v392_v10 = vpop.f32.mrf.mxu0  ;;  %v465_v22 = vpop.f32.mrf.mxu1 }
 0x12d   :  { %2894 = vst [vmem:[#allocation27_spill] sm:$0xff] %v2542_v0  ;;  %2895 = vst [vmem:[#allocation28_spill] sm:$0xff] %v2545_v12  ;;  %v2547_v27 = vadd.f32 %v392_v10, %v135_v23  ;;  %v2550_v26 = vadd.f32 %v465_v22, %v2500_v20 }
 0x12e   :  { %v396_v30 = vpop.f32.mrf.mxu0  ;;  %v469_v31 = vpop.f32.mrf.mxu1 }
 0x12f   :  { %2896 = vst [vmem:[#allocation29_spill] sm:$0xff] %v2547_v27  ;;  %2897 = vst [vmem:[#allocation30_spill] sm:$0xff] %v2550_v26  ;;  %v2552_v53 = vadd.f32 %v396_v30, %v131_v19  ;;  %v2555_v44 = vadd.f32 %v469_v31, %v2494_v15 }
 0x130   :  { %v398_v7 = vpop.f32.mrf.mxu0  ;;  %v471_v8 = vpop.f32.mrf.mxu1 }
 0x131   :  { %2898 = vst [vmem:[#allocation31_spill] sm:$0xff] %v2552_v53  ;;  %2899 = vst [vmem:[#allocation32_spill] sm:$0xff] %v2555_v44  ;;  %v2557_v0 = vadd.f32 %v398_v7, %v135_v23  ;;  %v2560_v11 = vadd.f32 %v471_v8, %v2500_v20  ;;  %v367_v53 = vadd.f32 %v2490_v13, %v131_v19 }
 0x132   :  { %v400_v12 = vpop.f32.mrf.mxu0  ;;  %v473_v10 = vpop.f32.mrf.mxu1  ;;  %v369_v8 = vadd.f32 %v2496_v17, %v135_v23 }
 0x133   :  { %2900 = vst [vmem:[#allocation33_spill] sm:$0xff] %v2557_v0  ;;  %2901 = vst [vmem:[#allocation34_spill] sm:$0xff] %v2560_v11  ;;  %v2562_v27 = vadd.f32 %v400_v12, %v131_v19  ;;  %v2565_v22 = vadd.f32 %v473_v10, %v2494_v15  ;;  %v442_v19 = vadd.f32 %v2498_v18, %v2500_v20 }
 0x134   :  { %v402_v26 = vpop.f32.mrf.mxu0  ;;  %v475_v30 = vpop.f32.mrf.mxu1 }
 0x135   :  { %2902 = vst [vmem:[#allocation35_spill] sm:$0xff] %v2562_v27  ;;  %2903 = vst [vmem:[#allocation36_spill] sm:$0xff] %v2565_v22  ;;  %v2568_v31 = vadd.f32 %v402_v26, %v135_v23  ;;  %v2571_v44 = vadd.f32 %v475_v30, %v2500_v20  ;;  %v440_v30 = vadd.f32 %v2492_v14, %v2494_v15 }
 0x136   :  { %v743_v7 = vpop.f32.mrf.mxu0  ;;  %v784_v0 = vpop.f32.mrf.mxu1 }
 0x137   :  { %v791_v11 = vadd.f32 %v743_v7, %v367_v53  ;;  %v793_v53 = vadd.f32 %v784_v0, %v440_v30 }
 0x138   :  { %v745_v21 = vpop.f32.mrf.mxu0  ;;  %v786_v12 = vpop.f32.mrf.mxu1 }
 0x139   :  { %v1828_v27 = vmul.f32 -1.442695, %v791_v11  ;;  %v792_v16 = vadd.f32 %v745_v21, %v369_v8  ;;  %v794_v26 = vadd.f32 %v786_v12, %v442_v19 }
 0x13a   :  { %v747_v10 = vpop.f32.mrf.mxu0  ;;  %v788_v22 = vpop.f32.mrf.mxu1 }
 0x13b   :  { %2011 = vpow2.f32 %v1828_v27  ;;  %v1829_v9 = vmul.f32 -1.442695, %v792_v16  ;;  %v1830_v17 = vmul.f32 -1.442695, %v794_v26  ;;  %v2904_v10 = vmov 0  }
 0x13c   :  { %v748_v35 = vpop.f32.mrf.mxu0  ;;  %v789_v13 = vpop.f32.mrf.mxu1 }
 0x13d   :  { %2013 = vpow2.f32 %v1829_v9 }
 0x13e   :  { %2015 = vpow2.f32 %v1830_v17 }
 0x148   :  { %v2012_v23 = vpop.eup %2011 }
 0x149   :  { %v798_v7 = vadd.f32 1.0, %v2012_v23 }
 0x14a   :  { %v2014_v11 = vpop.eup %2013 }
 0x14b   :  { %2017 = vrcp.f32 %v798_v7  ;;  %v804_v21 = vadd.f32 1.0, %v2014_v11  ;;  %v2016_v35 = vpop.eup %2015 }
 0x14c   :  { %2019 = vtanh.f32 %v793_v53  ;;  %v811_v22 = vadd.f32 1.0, %v2016_v35 }
 0x14d   :  { %2021 = vrcp.f32 %v804_v21 }
 0x14e   :  { %2023 = vrcp.f32 %v811_v22 }
 0x158   :  { %v2018_v16 = vpop.eup %2017 }
 0x159   :  { %v2020_v9 = vpop.eup %2019 }
 0x15a   :  { %v2022_v27 = vpop.eup %2021  ;;  %v815_v20 = vmul.f32 %v2020_v9, %v2018_v16 }
 0x15b   :  { %v814_v18 = vmul.f32 0.0, %v2022_v27  ;;  %v2024_v0 = vpop.eup %2023 }
 0x15d   :  { %v2578_v8 = vadd.f32 %v815_v20, %v814_v18 }
 0x15f   :  { %2025 = vtanh.f32 %v2578_v8 }
 0x16c   :  { %v2026_v14 = vpop.eup %2025 }
 0x16d   :  { %v818_v15 = vmul.f32 %v2026_v14, %v2024_v0 }
 0x16f   :  { %v823_v12 = vpack.c.bf16 %v818_v15, %v818_v15 }
 0x171   :  { %857 = vmatmul.mubr.bf16.vlgmr.msra.gmra.mxu0 %v823_v12  ;;  %898 = vmatmul.mubr.bf16.vlgmr.msra.gmra.mxu1 %v823_v12 }
 0x172   :  { %940 = vmatpush1.bf16.msra.mxu0 %v2351_v36  ;;  %981 = vmatpush1.bf16.msra.mxu1 %v2353_v37 }
 0x173   :  { %941 = vmatprep.subr.bf16.mxu0 %v2357_v38  ;;  %982 = vmatprep.subr.bf16.mxu1 %v2359_v39 }
 0x174   :  { %971 = vmatprep.mubr.bf16.mxu0 %v2904_v10  ;;  %1012 = vmatprep.mubr.bf16.mxu1 %v2904_v10 }
 0x176   :  { %942 = vmatpush1.bf16.msra.mxu0 %v2361_v40  ;;  %983 = vmatpush1.bf16.msra.mxu1 %v2365_v41 }
 0x177   :  { %943 = vmatprep.subr.bf16.mxu0 %v2369_v42  ;;  %984 = vmatprep.subr.bf16.mxu1 %v2371_v43 }
 0x17a   :  { %944 = vmatpush1.bf16.msra.mxu0 %v2375_v45  ;;  %985 = vmatpush1.bf16.msra.mxu1 %v2377_v46 }
 0x17b   :  { %945 = vmatprep.subr.bf16.mxu0 %v2381_v47  ;;  %986 = vmatprep.subr.bf16.mxu1 %v2385_v48 }
 0x17e   :  { %946 = vmatpush1.bf16.msra.mxu0 %v2387_v49  ;;  %987 = vmatpush1.bf16.msra.mxu1 %v2389_v50 }
 0x17f   :  { %947 = vmatprep.subr.bf16.mxu0 %v2393_v51  ;;  %988 = vmatprep.subr.bf16.mxu1 %v2397_v52 }
 0x182   :  { %948 = vmatpush1.bf16.msra.mxu0 %v2401_v54  ;;  %989 = vmatpush1.bf16.msra.mxu1 %v2403_v55 }
 0x183   :  { %949 = vmatprep.subr.bf16.mxu0 %v2405_v56  ;;  %990 = vmatprep.subr.bf16.mxu1 %v2407_v57 }
 0x186   :  { %950 = vmatpush1.bf16.msra.mxu0 %v2415_v58  ;;  %991 = vmatpush1.bf16.msra.mxu1 %v2417_v59 }
 0x187   :  { %951 = vmatprep.subr.bf16.mxu0 %v2421_v60  ;;  %992 = vmatprep.subr.bf16.mxu1 %v2423_v61 }
 0x18a   :  { %952 = vmatpush1.bf16.msra.mxu0 %v2429_v63  ;;  %993 = vmatpush1.bf16.msra.mxu1 %v2431_v1 }
 0x18b   :  { %953 = vmatprep.subr.bf16.mxu0 %v2435_v2  ;;  %994 = vmatprep.subr.bf16.mxu1 %v2437_v3 }
 0x18e   :  { %954 = vmatpush1.bf16.msra.mxu0 %v2441_v4  ;;  %995 = vmatpush1.bf16.msra.mxu1 %v2443_v5 }
 0x18f   :  { %1054 = vmatprep.subr.bf16.mxu0 %v2347_v33  ;;  %1095 = vmatprep.subr.bf16.mxu1 %v2349_v34 }
 0x231   :  { %v858_v13 = vpop.f32.mrf.mxu0  ;;  %v899_v19 = vpop.f32.mrf.mxu1 }
 0x232   :  { %v906_v26 = vadd.f32 %v858_v13, %v2502_v24  ;;  %v908_v27 = vadd.f32 %v899_v19, %v2505_v25 }
 0x233   :  { %v860_v30 = vpop.f32.mrf.mxu0  ;;  %v901_v17 = vpop.f32.mrf.mxu1 }
 0x234   :  { %v1831_v23 = vmul.f32 -1.442695, %v906_v26  ;;  %v907_v53 = vadd.f32 %v860_v30, %v2507_v28  ;;  %v909_v9 = vadd.f32 %v901_v17, %v2510_v29 }
 0x235   :  { %v862_v7 = vpop.f32.mrf.mxu0  ;;  %v903_v11 = vpop.f32.mrf.mxu1 }
 0x236   :  { %2027 = vpow2.f32 %v1831_v23  ;;  %v1832_v21 = vmul.f32 -1.442695, %v907_v53  ;;  %v1833_v22 = vmul.f32 -1.442695, %v909_v9 }
 0x237   :  { %v863_v35 = vpop.f32.mrf.mxu0  ;;  %v904_v16 = vpop.f32.mrf.mxu1 }
 0x238   :  { %2029 = vpow2.f32 %v1832_v21 }
 0x239   :  { %2031 = vtanh.f32 %v908_v27 }
 0x23a   :  { %2033 = vpow2.f32 %v1833_v22 }
 0x243   :  { %v2028_v18 = vpop.eup %2027 }
 0x244   :  { %v913_v20 = vadd.f32 1.0, %v2028_v18 }
 0x245   :  { %v2030_v24 = vpop.eup %2029 }
 0x246   :  { %2035 = vrcp.f32 %v913_v20  ;;  %v919_v0 = vadd.f32 1.0, %v2030_v24  ;;  %v2032_v28 = vpop.eup %2031 }
 0x247   :  { %v2034_v14 = vpop.eup %2033 }
 0x248   :  { %2037 = vrcp.f32 %v919_v0  ;;  %v926_v26 = vadd.f32 1.0, %v2034_v14  ;;  %v2905_v0 = vld [vmem:[#allocation18_spill] sm:$0xff] }
 0x24a   :  { %2039 = vrcp.f32 %v926_v26 }
 0x253   :  { %v2036_v15 = vpop.eup %2035 }
 0x254   :  { %v930_v12 = vmul.f32 %v2036_v15, %v2032_v28 }
 0x255   :  { %v2038_v13 = vpop.eup %2037 }
 0x256   :  { %v929_v30 = vmul.f32 %v2038_v13, %v2578_v8 }
 0x257   :  { %v2040_v25 = vpop.eup %2039 }
 0x258   :  { %v2620_v29 = vadd.f32 %v930_v12, %v929_v30 }
 0x25a   :  { %2041 = vtanh.f32 %v2620_v29 }
 0x267   :  { %v2042_v19 = vpop.eup %2041 }
 0x268   :  { %v933_v17 = vmul.f32 %v2042_v19, %v2040_v25 }
 0x26a   :  { %v938_v23 = vpack.c.bf16 %v933_v17, %v933_v17 }
 0x26c   :  { %972 = vmatmul.mubr.bf16.vlgmr.msra.gmra.mxu0 %v938_v23  ;;  %1013 = vmatmul.mubr.bf16.vlgmr.msra.gmra.mxu1 %v938_v23 }
 0x26d   :  { %1055 = vmatpush1.bf16.msra.mxu0 %v2351_v36  ;;  %1096 = vmatpush1.bf16.msra.mxu1 %v2353_v37 }
 0x26e   :  { %1056 = vmatprep.subr.bf16.mxu0 %v2357_v38  ;;  %1097 = vmatprep.subr.bf16.mxu1 %v2359_v39 }
 0x26f   :  { %1086 = vmatprep.mubr.bf16.mxu0 %v2904_v10  ;;  %1127 = vmatprep.mubr.bf16.mxu1 %v2904_v10 }
 0x271   :  { %1057 = vmatpush1.bf16.msra.mxu0 %v2361_v40  ;;  %1098 = vmatpush1.bf16.msra.mxu1 %v2365_v41 }
 0x272   :  { %1058 = vmatprep.subr.bf16.mxu0 %v2369_v42  ;;  %1099 = vmatprep.subr.bf16.mxu1 %v2371_v43 }
 0x275   :  { %1059 = vmatpush1.bf16.msra.mxu0 %v2375_v45  ;;  %1100 = vmatpush1.bf16.msra.mxu1 %v2377_v46 }
 0x276   :  { %1060 = vmatprep.subr.bf16.mxu0 %v2381_v47  ;;  %1101 = vmatprep.subr.bf16.mxu1 %v2385_v48 }
 0x279   :  { %1061 = vmatpush1.bf16.msra.mxu0 %v2387_v49  ;;  %1102 = vmatpush1.bf16.msra.mxu1 %v2389_v50 }
 0x27a   :  { %1062 = vmatprep.subr.bf16.mxu0 %v2393_v51  ;;  %1103 = vmatprep.subr.bf16.mxu1 %v2397_v52 }
 0x27d   :  { %1063 = vmatpush1.bf16.msra.mxu0 %v2401_v54  ;;  %1104 = vmatpush1.bf16.msra.mxu1 %v2403_v55 }
 0x27e   :  { %1064 = vmatprep.subr.bf16.mxu0 %v2405_v56  ;;  %1105 = vmatprep.subr.bf16.mxu1 %v2407_v57 }
 0x281   :  { %1065 = vmatpush1.bf16.msra.mxu0 %v2415_v58  ;;  %1106 = vmatpush1.bf16.msra.mxu1 %v2417_v59 }
 0x282   :  { %1066 = vmatprep.subr.bf16.mxu0 %v2421_v60  ;;  %1107 = vmatprep.subr.bf16.mxu1 %v2423_v61 }
 0x285   :  { %1067 = vmatpush1.bf16.msra.mxu0 %v2429_v63  ;;  %1108 = vmatpush1.bf16.msra.mxu1 %v2431_v1 }
 0x286   :  { %1068 = vmatprep.subr.bf16.mxu0 %v2435_v2  ;;  %1109 = vmatprep.subr.bf16.mxu1 %v2437_v3 }
 0x289   :  { %1069 = vmatpush1.bf16.msra.mxu0 %v2441_v4  ;;  %1110 = vmatpush1.bf16.msra.mxu1 %v2443_v5 }
 0x28a   :  { %1169 = vmatprep.subr.bf16.mxu0 %v2347_v33  ;;  %1210 = vmatprep.subr.bf16.mxu1 %v2349_v34 }
 0x32c   :  { %v973_v8 = vpop.f32.mrf.mxu0  ;;  %v1014_v53 = vpop.f32.mrf.mxu1 }
 0x32d   :  { %v1021_v7 = vadd.f32 %v973_v8, %v2512_v32  ;;  %v1023_v28 = vadd.f32 %v1014_v53, %v2905_v0 }
 0x32e   :  { %v975_v11 = vpop.f32.mrf.mxu0  ;;  %v1016_v21 = vpop.f32.mrf.mxu1 }
 0x32f   :  { %v1834_v35 = vmul.f32 -1.442695, %v1021_v7  ;;  %v1022_v16 = vadd.f32 %v975_v11, %v2517_v62  ;;  %v1024_v24 = vadd.f32 %v1016_v21, %v2520_v6 }
 0x330   :  { %v977_v9 = vpop.f32.mrf.mxu0  ;;  %v1018_v27 = vpop.f32.mrf.mxu1 }
 0x331   :  { %2043 = vpow2.f32 %v1834_v35  ;;  %v1835_v22 = vmul.f32 -1.442695, %v1022_v16  ;;  %v1836_v14 = vmul.f32 -1.442695, %v1024_v24  ;;  %v2906_v35 = vld [vmem:[#allocation19_spill] sm:$0xff] }
 0x332   :  { %v978_v18 = vpop.f32.mrf.mxu0  ;;  %v1019_v20 = vpop.f32.mrf.mxu1 }
 0x333   :  { %2045 = vpow2.f32 %v1835_v22  ;;  %v2907_v18 = vld [vmem:[#allocation21_spill] sm:$0xff] }
 0x334   :  { %2047 = vtanh.f32 %v1023_v28 }
 0x335   :  { %2049 = vpow2.f32 %v1836_v14 }
 0x33e   :  { %v2044_v15 = vpop.eup %2043 }
 0x33f   :  { %v1028_v12 = vadd.f32 1.0, %v2044_v15 }
 0x340   :  { %v2046_v32 = vpop.eup %2045 }
 0x341   :  { %2051 = vrcp.f32 %v1028_v12  ;;  %v1034_v13 = vadd.f32 1.0, %v2046_v32  ;;  %v2048_v62 = vpop.eup %2047  ;;  %v2908_v12 = vld [vmem:[#allocation22_spill] sm:$0xff]  ;;  %v2909_v32 = vld [vmem:[#allocation20_spill] sm:$0xff] }
 0x342   :  { %v2050_v26 = vpop.eup %2049 }
 0x343   :  { %2053 = vrcp.f32 %v1034_v13  ;;  %v1041_v17 = vadd.f32 1.0, %v2050_v26 }
 0x345   :  { %2055 = vrcp.f32 %v1041_v17 }
 0x34e   :  { %v2052_v30 = vpop.eup %2051 }
 0x34f   :  { %v1045_v25 = vmul.f32 %v2052_v30, %v2048_v62 }
 0x350   :  { %v2054_v19 = vpop.eup %2053 }
 0x351   :  { %v1044_v23 = vmul.f32 %v2054_v19, %v2620_v29 }
 0x352   :  { %v2056_v8 = vpop.eup %2055 }
 0x353   :  { %v2662_v6 = vadd.f32 %v1045_v25, %v1044_v23 }
 0x355   :  { %2057 = vtanh.f32 %v2662_v6 }
 0x362   :  { %v2058_v53 = vpop.eup %2057 }
 0x363   :  { %v1048_v7 = vmul.f32 %v2058_v53, %v2056_v8 }
 0x365   :  { %v1053_v11 = vpack.c.bf16 %v1048_v7, %v1048_v7 }
 0x367   :  { %1087 = vmatmul.mubr.bf16.vlgmr.msra.gmra.mxu0 %v1053_v11  ;;  %1128 = vmatmul.mubr.bf16.vlgmr.msra.gmra.mxu1 %v1053_v11 }
 0x368   :  { %1170 = vmatpush1.bf16.msra.mxu0 %v2351_v36  ;;  %1211 = vmatpush1.bf16.msra.mxu1 %v2353_v37 }
 0x369   :  { %1171 = vmatprep.subr.bf16.mxu0 %v2357_v38  ;;  %1212 = vmatprep.subr.bf16.mxu1 %v2359_v39 }
 0x36a   :  { %1201 = vmatprep.mubr.bf16.mxu0 %v2904_v10  ;;  %1242 = vmatprep.mubr.bf16.mxu1 %v2904_v10 }
 0x36c   :  { %1172 = vmatpush1.bf16.msra.mxu0 %v2361_v40  ;;  %1213 = vmatpush1.bf16.msra.mxu1 %v2365_v41 }
 0x36d   :  { %1173 = vmatprep.subr.bf16.mxu0 %v2369_v42  ;;  %1214 = vmatprep.subr.bf16.mxu1 %v2371_v43 }
 0x370   :  { %1174 = vmatpush1.bf16.msra.mxu0 %v2375_v45  ;;  %1215 = vmatpush1.bf16.msra.mxu1 %v2377_v46 }
 0x371   :  { %1175 = vmatprep.subr.bf16.mxu0 %v2381_v47  ;;  %1216 = vmatprep.subr.bf16.mxu1 %v2385_v48 }
 0x374   :  { %1176 = vmatpush1.bf16.msra.mxu0 %v2387_v49  ;;  %1217 = vmatpush1.bf16.msra.mxu1 %v2389_v50 }
 0x375   :  { %1177 = vmatprep.subr.bf16.mxu0 %v2393_v51  ;;  %1218 = vmatprep.subr.bf16.mxu1 %v2397_v52 }
 0x378   :  { %1178 = vmatpush1.bf16.msra.mxu0 %v2401_v54  ;;  %1219 = vmatpush1.bf16.msra.mxu1 %v2403_v55 }
 0x379   :  { %1179 = vmatprep.subr.bf16.mxu0 %v2405_v56  ;;  %1220 = vmatprep.subr.bf16.mxu1 %v2407_v57 }
 0x37c   :  { %1180 = vmatpush1.bf16.msra.mxu0 %v2415_v58  ;;  %1221 = vmatpush1.bf16.msra.mxu1 %v2417_v59 }
 0x37d   :  { %1181 = vmatprep.subr.bf16.mxu0 %v2421_v60  ;;  %1222 = vmatprep.subr.bf16.mxu1 %v2423_v61 }
 0x380   :  { %1182 = vmatpush1.bf16.msra.mxu0 %v2429_v63  ;;  %1223 = vmatpush1.bf16.msra.mxu1 %v2431_v1 }
 0x381   :  { %1183 = vmatprep.subr.bf16.mxu0 %v2435_v2  ;;  %1224 = vmatprep.subr.bf16.mxu1 %v2437_v3 }
 0x384   :  { %1184 = vmatpush1.bf16.msra.mxu0 %v2441_v4  ;;  %1225 = vmatpush1.bf16.msra.mxu1 %v2443_v5 }
 0x385   :  { %1284 = vmatprep.subr.bf16.mxu0 %v2347_v33  ;;  %1325 = vmatprep.subr.bf16.mxu1 %v2349_v34 }
 0x427   :  { %v1088_v29 = vpop.f32.mrf.mxu0  ;;  %v1129_v21 = vpop.f32.mrf.mxu1 }
 0x428   :  { %v1136_v16 = vadd.f32 %v1088_v29, %v2906_v35  ;;  %v1138_v34 = vadd.f32 %v1129_v21, %v2909_v32 }
 0x429   :  { %v1090_v9 = vpop.f32.mrf.mxu0  ;;  %v1131_v27 = vpop.f32.mrf.mxu1 }
 0x42a   :  { %v1837_v22 = vmul.f32 -1.442695, %v1136_v16  ;;  %v1137_v20 = vadd.f32 %v1090_v9, %v2907_v18  ;;  %v1139_v33 = vadd.f32 %v1131_v27, %v2908_v12 }
 0x42b   :  { %v1092_v24 = vpop.f32.mrf.mxu0  ;;  %v1133_v0 = vpop.f32.mrf.mxu1 }
 0x42c   :  { %2059 = vpow2.f32 %v1837_v22  ;;  %v1838_v28 = vmul.f32 -1.442695, %v1137_v20  ;;  %v1839_v13 = vmul.f32 -1.442695, %v1139_v33 }
 0x42d   :  { %v1093_v14 = vpop.f32.mrf.mxu0  ;;  %v1134_v15 = vpop.f32.mrf.mxu1 }
 0x42e   :  { %2061 = vpow2.f32 %v1838_v28 }
 0x42f   :  { %2063 = vtanh.f32 %v1138_v34 }
 0x430   :  { %2065 = vpow2.f32 %v1839_v13 }
 0x439   :  { %v2060_v62 = vpop.eup %2059 }
 0x43a   :  { %v1143_v26 = vadd.f32 1.0, %v2060_v62 }
 0x43b   :  { %v2062_v30 = vpop.eup %2061 }
 0x43c   :  { %2067 = vrcp.f32 %v1143_v26  ;;  %v1149_v25 = vadd.f32 1.0, %v2062_v30  ;;  %v2064_v19 = vpop.eup %2063  ;;  %v2753_v30 = vld [vmem:[#allocation10 + $0xe0] ss:$16 sps:$4 sm:$0xff]  }
 0x43d   :  { %v2066_v17 = vpop.eup %2065 }
 0x43e   :  { %2069 = vrcp.f32 %v1149_v25  ;;  %v1156_v7 = vadd.f32 1.0, %v2066_v17  ;;  %v2756_v25 = vld [vmem:[#allocation10 + $0xe8] ss:$16 sps:$4 sm:$0xff]   ;;  %v2762_v17 = vld [vmem:[#allocation10 + $0xcc] ss:$16 sps:$4 sm:$0xff]  }
 0x440   :  { %2071 = vrcp.f32 %v1156_v7  ;;  %v2776_v7 = vld [vmem:[#allocation10 + $0xac] ss:$16 sps:$4 sm:$0xff]  }
 0x449   :  { %v2068_v23 = vpop.eup %2067 }
 0x44a   :  { %v1160_v8 = vmul.f32 %v2068_v23, %v2064_v19  ;;  %v2759_v19 = vld [vmem:[#allocation10 + $0xc4] ss:$16 sps:$4 sm:$0xff]   ;;  %v2767_v23 = vld [vmem:[#allocation10 + $0xc0] ss:$16 sps:$4 sm:$0xff]  }
 0x44b   :  { %v2070_v53 = vpop.eup %2069 }
 0x44c   :  { %v1159_v11 = vmul.f32 %v2070_v53, %v2662_v6  ;;  %v2773_v53 = vld [vmem:[#allocation10 + $0xa4] ss:$16 sps:$4 sm:$0xff]  }
 0x44d   :  { %v2072_v21 = vpop.eup %2071 }
 0x44e   :  { %v2704_v29 = vadd.f32 %v1160_v8, %v1159_v11  ;;  %v2770_v8 = vld [vmem:[#allocation10 + $0xc8] ss:$16 sps:$4 sm:$0xff]   ;;  %v2779_v11 = vld [vmem:[#allocation10 + $0xa0] ss:$16 sps:$4 sm:$0xff]  }
 0x450   :  { %2073 = vtanh.f32 %v2704_v29 }
 0x45d   :  { %v2074_v35 = vpop.eup %2073 }
 0x45e   :  { %v1163_v16 = vmul.f32 %v2074_v35, %v2072_v21  ;;  %v2785_v21 = vld [vmem:[#allocation10 + $0x84] ss:$16 sps:$4 sm:$0xff]   ;;  %v2788_v35 = vld [vmem:[#allocation10 + $0x8c] ss:$16 sps:$4 sm:$0xff]  }
 0x460   :  { %v1168_v9 = vpack.c.bf16 %v1163_v16, %v1163_v16  ;;  %v2791_v16 = vld [vmem:[#allocation10 + $0x80] ss:$16 sps:$4 sm:$0xff]  }
 0x462   :  { %1202 = vmatmul.mubr.bf16.vlgmr.msra.gmra.mxu0 %v1168_v9  ;;  %1243 = vmatmul.mubr.bf16.vlgmr.msra.gmra.mxu1 %v1168_v9  ;;  %v2794_v9 = vld [vmem:[#allocation10 + $0x88] ss:$16 sps:$4 sm:$0xff]  }
 0x463   :  { %1285 = vmatpush1.bf16.msra.mxu0 %v2351_v36  ;;  %1326 = vmatpush1.bf16.msra.mxu1 %v2353_v37  ;;  %v2739_v36 = vld [vmem:[#allocation10 + $0xe4] ss:$16 sps:$4 sm:$0xff]   ;;  %v2742_v37 = vld [vmem:[#allocation10 + $0xec] ss:$16 sps:$4 sm:$0xff]  }
 0x464   :  { %1286 = vmatprep.subr.bf16.mxu0 %v2357_v38  ;;  %1327 = vmatprep.subr.bf16.mxu1 %v2359_v39 }
 0x465   :  { %1316 = vmatprep.mubr.bf16.mxu0 %v2904_v10  ;;  %1357 = vmatprep.mubr.bf16.mxu1 %v2904_v10 }
 0x467   :  { %1287 = vmatpush1.bf16.msra.mxu0 %v2361_v40  ;;  %1328 = vmatpush1.bf16.msra.mxu1 %v2365_v41  ;;  %v2910_v40 = vld [vmem:[#allocation23_spill] sm:$0xff] }
 0x468   :  { %1288 = vmatprep.subr.bf16.mxu0 %v2369_v42  ;;  %1329 = vmatprep.subr.bf16.mxu1 %v2371_v43 }
 0x46b   :  { %1289 = vmatpush1.bf16.msra.mxu0 %v2375_v45  ;;  %1330 = vmatpush1.bf16.msra.mxu1 %v2377_v46  ;;  %v2911_v46 = vld [vmem:[#allocation25_spill] sm:$0xff] }
 0x46c   :  { %1290 = vmatprep.subr.bf16.mxu0 %v2381_v47  ;;  %1331 = vmatprep.subr.bf16.mxu1 %v2385_v48 }
 0x46f   :  { %1291 = vmatpush1.bf16.msra.mxu0 %v2387_v49  ;;  %1332 = vmatpush1.bf16.msra.mxu1 %v2389_v50 }
 0x470   :  { %1292 = vmatprep.subr.bf16.mxu0 %v2393_v51  ;;  %1333 = vmatprep.subr.bf16.mxu1 %v2397_v52 }
 0x473   :  { %1293 = vmatpush1.bf16.msra.mxu0 %v2401_v54  ;;  %1334 = vmatpush1.bf16.msra.mxu1 %v2403_v55  ;;  %v2912_v54 = vld [vmem:[#allocation26_spill] sm:$0xff] }
 0x474   :  { %1294 = vmatprep.subr.bf16.mxu0 %v2405_v56  ;;  %1335 = vmatprep.subr.bf16.mxu1 %v2407_v57  ;;  %v2913_v56 = vld [vmem:[#allocation24_spill] sm:$0xff] }
 0x477   :  { %1295 = vmatpush1.bf16.msra.mxu0 %v2415_v58  ;;  %1336 = vmatpush1.bf16.msra.mxu1 %v2417_v59 }
 0x478   :  { %1296 = vmatprep.subr.bf16.mxu0 %v2421_v60  ;;  %1337 = vmatprep.subr.bf16.mxu1 %v2423_v61 }
 0x47b   :  { %1297 = vmatpush1.bf16.msra.mxu0 %v2429_v63  ;;  %1338 = vmatpush1.bf16.msra.mxu1 %v2431_v1 }
 0x47c   :  { %1298 = vmatprep.subr.bf16.mxu0 %v2435_v2  ;;  %1339 = vmatprep.subr.bf16.mxu1 %v2437_v3 }
 0x47f   :  { %1299 = vmatpush1.bf16.msra.mxu0 %v2441_v4  ;;  %1340 = vmatpush1.bf16.msra.mxu1 %v2443_v5 }
 0x480   :  { %1399 = vmatprep.subr.bf16.mxu0 %v2739_v36  ;;  %1440 = vmatprep.subr.bf16.mxu1 %v2742_v37 }
 0x522   :  { %v1203_v38 = vpop.f32.mrf.mxu0  ;;  %v1244_v39 = vpop.f32.mrf.mxu1 }
 0x523   :  { %v1251_v41 = vadd.f32 %v1203_v38, %v2910_v40  ;;  %v1253_v57 = vadd.f32 %v1244_v39, %v2913_v56  ;;  %v2797_v38 = vld [vmem:[#allocation10 + $0x64] ss:$16 sps:$4 sm:$0xff]   ;;  %v2800_v39 = vld [vmem:[#allocation10 + $0x6c] ss:$16 sps:$4 sm:$0xff]   ;;  %v2803_v40 = vld [vmem:[#allocation10 + $0x60] ss:$16 sps:$4 sm:$0xff]  }
 0x524   :  { %v1205_v42 = vpop.f32.mrf.mxu0  ;;  %v1246_v43 = vpop.f32.mrf.mxu1 }
 0x525   :  { %v1840_v45 = vmul.f32 -1.442695, %v1251_v41  ;;  %v1252_v47 = vadd.f32 %v1205_v42, %v2911_v46  ;;  %v1254_v55 = vadd.f32 %v1246_v43, %v2912_v54  ;;  %v2806_v41 = vld [vmem:[#allocation10 + $0x68] ss:$16 sps:$4 sm:$0xff]   ;;  %v2809_v42 = vld [vmem:[#allocation10 + $0x44] ss:$16 sps:$4 sm:$0xff]  }
 0x526   :  { %v1207_v48 = vpop.f32.mrf.mxu0  ;;  %v1248_v49 = vpop.f32.mrf.mxu1  ;;  %v2812_v43 = vld [vmem:[#allocation10 + $0x4c] ss:$16 sps:$4 sm:$0xff]  }
 0x527   :  { %2075 = vpow2.f32 %v1840_v45  ;;  %v1841_v50 = vmul.f32 -1.442695, %v1252_v47  ;;  %v1842_v6 = vmul.f32 -1.442695, %v1254_v55 }
 0x528   :  { %v1208_v51 = vpop.f32.mrf.mxu0  ;;  %v1249_v52 = vpop.f32.mrf.mxu1 }
 0x529   :  { %2077 = vpow2.f32 %v1841_v50  ;;  %v2917_v50 = vld [vmem:[#allocation28_spill] sm:$0xff] }
 0x52a   :  { %2079 = vtanh.f32 %v1253_v57 }
 0x52b   :  { %2081 = vpow2.f32 %v1842_v6 }
 0x534   :  { %v2076_v27 = vpop.eup %2075 }
 0x535   :  { %v1258_v22 = vadd.f32 1.0, %v2076_v27 }
 0x536   :  { %v2078_v18 = vpop.eup %2077 }
 0x537   :  { %2083 = vrcp.f32 %v1258_v22  ;;  %v1264_v20 = vadd.f32 1.0, %v2078_v18  ;;  %v2080_v24 = vpop.eup %2079 }
 0x538   :  { %v2082_v0 = vpop.eup %2081 }
 0x539   :  { %2085 = vrcp.f32 %v1264_v20  ;;  %v1271_v12 = vadd.f32 1.0, %v2082_v0 }
 0x53b   :  { %2087 = vrcp.f32 %v1271_v12 }
 0x544   :  { %v2084_v28 = vpop.eup %2083 }
 0x545   :  { %v1275_v14 = vmul.f32 %v2084_v28, %v2080_v24 }
 0x546   :  { %v2086_v15 = vpop.eup %2085 }
 0x547   :  { %v1274_v33 = vmul.f32 %v2086_v15, %v2704_v29  ;;  %v2782_v29 = vld [vmem:[#allocation10 + $0xa8] ss:$16 sps:$4 sm:$0xff]  }
 0x548   :  { %v2088_v34 = vpop.eup %2087 }
 0x549   :  { %v2750_v32 = vadd.f32 %v1275_v14, %v1274_v33  ;;  %v2162_v33 = vld [vmem:[#allocation10 + $0x48] ss:$16 sps:$4 sm:$0xff]  }
 0x54b   :  { %2089 = vtanh.f32 %v2750_v32 }
 0x558   :  { %v2090_v13 = vpop.eup %2089 }
 0x559   :  { %v1278_v62 = vmul.f32 %v2090_v13, %v2088_v34  ;;  %v2164_v34 = vld [vmem:[#allocation10 + $0x2c] ss:$16 sps:$4 sm:$0xff]   ;;  %v2165_v13 = vld [vmem:[#allocation10 + $0x20] ss:$16 sps:$4 sm:$0xff]  }
 0x55b   :  { %v1283_v26 = vpack.c.bf16 %v1278_v62, %v1278_v62  ;;  %v2166_v62 = vld [vmem:[#allocation10 + $0x28] ss:$16 sps:$4 sm:$0xff]  }
 0x55d   :  { %1317 = vmatmul.mubr.bf16.vlgmr.msra.gmra.mxu0 %v1283_v26  ;;  %1358 = vmatmul.mubr.bf16.vlgmr.msra.gmra.mxu1 %v1283_v26  ;;  %v2167_v26 = vld [vmem:[#allocation10 + $0x4] ss:$16 sps:$4 sm:$0xff]  }
 0x55e   :  { %1400 = vmatpush1.bf16.msra.mxu0 %v2753_v30  ;;  %1441 = vmatpush1.bf16.msra.mxu1 %v2756_v25 }
 0x55f   :  { %1401 = vmatprep.subr.bf16.mxu0 %v2759_v19  ;;  %1442 = vmatprep.subr.bf16.mxu1 %v2762_v17 }
 0x560   :  { %1431 = vmatprep.mubr.bf16.mxu0 %v2904_v10  ;;  %1472 = vmatprep.mubr.bf16.mxu1 %v2904_v10 }
 0x562   :  { %1402 = vmatpush1.bf16.msra.mxu0 %v2767_v23  ;;  %1443 = vmatpush1.bf16.msra.mxu1 %v2770_v8 }
 0x563   :  { %1403 = vmatprep.subr.bf16.mxu0 %v2773_v53  ;;  %1444 = vmatprep.subr.bf16.mxu1 %v2776_v7 }
 0x566   :  { %1404 = vmatpush1.bf16.msra.mxu0 %v2779_v11  ;;  %1445 = vmatpush1.bf16.msra.mxu1 %v2782_v29 }
 0x567   :  { %1405 = vmatprep.subr.bf16.mxu0 %v2785_v21  ;;  %1446 = vmatprep.subr.bf16.mxu1 %v2788_v35 }
 0x56a   :  { %1406 = vmatpush1.bf16.msra.mxu0 %v2791_v16  ;;  %1447 = vmatpush1.bf16.msra.mxu1 %v2794_v9 }
 0x56b   :  { %1407 = vmatprep.subr.bf16.mxu0 %v2797_v38  ;;  %1448 = vmatprep.subr.bf16.mxu1 %v2800_v39 }
 0x56e   :  { %1408 = vmatpush1.bf16.msra.mxu0 %v2803_v40  ;;  %1449 = vmatpush1.bf16.msra.mxu1 %v2806_v41 }
 0x56f   :  { %1409 = vmatprep.subr.bf16.mxu0 %v2809_v42  ;;  %1450 = vmatprep.subr.bf16.mxu1 %v2812_v43 }
 0x572   :  { %1410 = vmatpush1.bf16.msra.mxu0 %v2415_v58  ;;  %1451 = vmatpush1.bf16.msra.mxu1 %v2417_v59 }
 0x573   :  { %1411 = vmatprep.subr.bf16.mxu0 %v2421_v60  ;;  %1452 = vmatprep.subr.bf16.mxu1 %v2423_v61  ;;  %v2914_v60 = vld [vmem:[#allocation27_spill] sm:$0xff] }
 0x576   :  { %1412 = vmatpush1.bf16.msra.mxu0 %v2429_v63  ;;  %1453 = vmatpush1.bf16.msra.mxu1 %v2431_v1  ;;  %v2915_v1 = vld [vmem:[#allocation29_spill] sm:$0xff] }
 0x577   :  { %1413 = vmatprep.subr.bf16.mxu0 %v2435_v2  ;;  %1454 = vmatprep.subr.bf16.mxu1 %v2437_v3 }
 0x57a   :  { %1414 = vmatpush1.bf16.msra.mxu0 %v2441_v4  ;;  %1455 = vmatpush1.bf16.msra.mxu1 %v2443_v5  ;;  %v2916_v5 = vld [vmem:[#allocation30_spill] sm:$0xff] }
 0x57b   :  { %1514 = vmatprep.subr.bf16.mxu0 %v2739_v36  ;;  %1555 = vmatprep.subr.bf16.mxu1 %v2742_v37 }
 0x61d   :  { %v1318_v58 = vpop.f32.mrf.mxu0  ;;  %v1359_v59 = vpop.f32.mrf.mxu1 }
 0x61e   :  { %v1366_v61 = vadd.f32 %v1318_v58, %v2914_v60  ;;  %v1368_v37 = vadd.f32 %v1359_v59, %v2917_v50 }
 0x61f   :  { %v1320_v45 = vpop.f32.mrf.mxu0  ;;  %v1361_v63 = vpop.f32.mrf.mxu1 }
 0x620   :  { %v1843_v46 = vmul.f32 -1.442695, %v1366_v61  ;;  %v1367_v47 = vadd.f32 %v1320_v45, %v2915_v1  ;;  %v1369_v36 = vadd.f32 %v1361_v63, %v2916_v5 }
 0x621   :  { %v1322_v2 = vpop.f32.mrf.mxu0  ;;  %v1363_v48 = vpop.f32.mrf.mxu1 }
 0x622   :  { %2091 = vpow2.f32 %v1843_v46  ;;  %v1844_v3 = vmul.f32 -1.442695, %v1367_v47  ;;  %v1845_v51 = vmul.f32 -1.442695, %v1369_v36 }
 0x623   :  { %v1323_v4 = vpop.f32.mrf.mxu0  ;;  %v1364_v49 = vpop.f32.mrf.mxu1 }
 0x624   :  { %2093 = vpow2.f32 %v1844_v3 }
 0x625   :  { %2095 = vtanh.f32 %v1368_v37 }
 0x626   :  { %2097 = vpow2.f32 %v1845_v51  ;;  %v2003_v51 = vld [vmem:[#allocation11 + $0x38] sm:$0xff]  }
 0x62f   :  { %v2092_v52 = vpop.eup %2091 }
 0x630   :  { %v1373_v54 = vadd.f32 1.0, %v2092_v52  ;;  %v2289_v52 = vmov 0.0  }
 0x631   :  { %v2094_v55 = vpop.eup %2093 }
 0x632   :  { %2099 = vrcp.f32 %v1373_v54  ;;  %v1379_v56 = vadd.f32 1.0, %v2094_v55  ;;  %v2096_v57 = vpop.eup %2095  ;;  %v2004_v54 = vld [vmem:[#allocation11 + $0x30] sm:$0xff]   ;;  %v2005_v55 = vld [vmem:[#allocation11 + $0x28] sm:$0xff]  }
 0x633   :  { %v2098_v6 = vpop.eup %2097 }
 0x634   :  { %2101 = vrcp.f32 %v1379_v56  ;;  %v1386_v20 = vadd.f32 1.0, %v2098_v6  ;;  %v2006_v56 = vld [vmem:[#allocation11 + $0x20] sm:$0xff]   ;;  %v2008_v6 = vld [vmem:[#allocation11 + $0x10] sm:$0xff]  }
 0x636   :  { %2103 = vrcp.f32 %v1386_v20 }
 0x63f   :  { %v2100_v27 = vpop.eup %2099 }
 0x640   :  { %v1390_v22 = vmul.f32 %v2100_v27, %v2096_v57  ;;  %v2007_v57 = vld [vmem:[#allocation11 + $0x18] sm:$0xff]   ;;  %v2009_v27 = vld [vmem:[#allocation11 + $0x8] sm:$0xff]  }
 0x641   :  { %v2102_v18 = vpop.eup %2101 }
 0x642   :  { %v1389_v24 = vmul.f32 %v2102_v18, %v2750_v32  ;;  %v2163_v32 = vld [vmem:[#allocation10 + $0x24] ss:$16 sps:$4 sm:$0xff]  }
 0x643   :  { %v2104_v28 = vpop.eup %2103 }
 0x644   :  { %v2832_v0 = vadd.f32 %v1390_v22, %v1389_v24  ;;  %v2010_v22 = vld [vmem:[#allocation11] sm:$0xff]   ;;  %v2922_v24 = vld [vmem:[#allocation35_spill] sm:$0xff] }
 0x646   :  { %2105 = vtanh.f32 %v2832_v0 }
 0x653   :  { %v2106_v14 = vpop.eup %2105 }
 0x654   :  { %v1393_v15 = vmul.f32 %v2106_v14, %v2104_v28 }
 0x656   :  { %v1398_v12 = vpack.c.bf16 %v1393_v15, %v1393_v15 }
 0x658   :  { %1432 = vmatmul.mubr.bf16.vlgmr.msra.gmra.mxu0 %v1398_v12  ;;  %1473 = vmatmul.mubr.bf16.vlgmr.msra.gmra.mxu1 %v1398_v12 }
 0x659   :  { %1515 = vmatpush1.bf16.msra.mxu0 %v2753_v30  ;;  %1556 = vmatpush1.bf16.msra.mxu1 %v2756_v25  ;;  %v2168_v30 = vld [vmem:[#allocation10 + $0xc] ss:$16 sps:$4 sm:$0xff]   ;;  %v2169_v25 = vld [vmem:[#allocation10] ss:$16 sps:$4 sm:$0xff]  }
 0x65a   :  { %1516 = vmatprep.subr.bf16.mxu0 %v2759_v19  ;;  %1557 = vmatprep.subr.bf16.mxu1 %v2762_v17  ;;  %v2170_v19 = vld [vmem:[#allocation10 + $0x8] ss:$16 sps:$4 sm:$0xff]  }
 0x65b   :  { %1546 = vmatprep.mubr.bf16.mxu0 %v2904_v10  ;;  %1587 = vmatprep.mubr.bf16.mxu1 %v2904_v10  ;;  %v2161_v10 = vld [vmem:[#allocation10 + $0x40] ss:$16 sps:$4 sm:$0xff]  }
 0x65d   :  { %1517 = vmatpush1.bf16.msra.mxu0 %v2767_v23  ;;  %1558 = vmatpush1.bf16.msra.mxu1 %v2770_v8  ;;  %v2918_v8 = vld [vmem:[#allocation31_spill] sm:$0xff] }
 0x65e   :  { %1518 = vmatprep.subr.bf16.mxu0 %v2773_v53  ;;  %1559 = vmatprep.subr.bf16.mxu1 %v2776_v7 }
 0x661   :  { %1519 = vmatpush1.bf16.msra.mxu0 %v2779_v11  ;;  %1560 = vmatpush1.bf16.msra.mxu1 %v2782_v29 }
 0x662   :  { %1520 = vmatprep.subr.bf16.mxu0 %v2785_v21  ;;  %1561 = vmatprep.subr.bf16.mxu1 %v2788_v35  ;;  %v2919_v21 = vld [vmem:[#allocation33_spill] sm:$0xff] }
 0x665   :  { %1521 = vmatpush1.bf16.msra.mxu0 %v2791_v16  ;;  %1562 = vmatpush1.bf16.msra.mxu1 %v2794_v9 }
 0x666   :  { %1522 = vmatprep.subr.bf16.mxu0 %v2797_v38  ;;  %1563 = vmatprep.subr.bf16.mxu1 %v2800_v39 }
 0x669   :  { %1523 = vmatpush1.bf16.msra.mxu0 %v2803_v40  ;;  %1564 = vmatpush1.bf16.msra.mxu1 %v2806_v41  ;;  %v2920_v41 = vld [vmem:[#allocation34_spill] sm:$0xff] }
 0x66a   :  { %1524 = vmatprep.subr.bf16.mxu0 %v2809_v42  ;;  %1565 = vmatprep.subr.bf16.mxu1 %v2812_v43  ;;  %v2921_v43 = vld [vmem:[#allocation32_spill] sm:$0xff] }
 0x66d   :  { %1525 = vmatpush1.bf16.msra.mxu0 %v2161_v10  ;;  %1566 = vmatpush1.bf16.msra.mxu1 %v2162_v33 }
 0x66e   :  { %1526 = vmatprep.subr.bf16.mxu0 %v2163_v32  ;;  %1567 = vmatprep.subr.bf16.mxu1 %v2164_v34 }
 0x671   :  { %1527 = vmatpush1.bf16.msra.mxu0 %v2165_v13  ;;  %1568 = vmatpush1.bf16.msra.mxu1 %v2166_v62 }
 0x672   :  { %1528 = vmatprep.subr.bf16.mxu0 %v2167_v26  ;;  %1569 = vmatprep.subr.bf16.mxu1 %v2168_v30  ;;  %v2923_v26 = vld [vmem:[#allocation36_spill] sm:$0xff] }
 0x675   :  { %1529 = vmatpush1.bf16.msra.mxu0 %v2169_v25  ;;  %1570 = vmatpush1.bf16.msra.mxu1 %v2170_v19 }
 0x676   :  { %1870 = vmatprep.subr.bf16.mxu0 %v2289_v52 }
 0x718   :  { %v1433_v17 = vpop.f32.mrf.mxu0  ;;  %v1474_v23 = vpop.f32.mrf.mxu1 }
 0x719   :  { %v1481_v53 = vadd.f32 %v1433_v17, %v2918_v8  ;;  %v1483_v58 = vadd.f32 %v1474_v23, %v2921_v43 }
 0x71a   :  { %v1435_v7 = vpop.f32.mrf.mxu0  ;;  %v1476_v11 = vpop.f32.mrf.mxu1 }
 0x71b   :  { %v1846_v29 = vmul.f32 -1.442695, %v1481_v53  ;;  %v1482_v35 = vadd.f32 %v1435_v7, %v2919_v21  ;;  %v1484_v42 = vadd.f32 %v1476_v11, %v2920_v41 }
 0x71c   :  { %v1437_v16 = vpop.f32.mrf.mxu0  ;;  %v1478_v9 = vpop.f32.mrf.mxu1 }
 0x71d   :  { %2107 = vpow2.f32 %v1846_v29  ;;  %v1847_v38 = vmul.f32 -1.442695, %v1482_v35  ;;  %v1848_v59 = vmul.f32 -1.442695, %v1484_v42 }
 0x71e   :  { %v1438_v39 = vpop.f32.mrf.mxu0  ;;  %v1479_v40 = vpop.f32.mrf.mxu1 }
 0x71f   :  { %2109 = vpow2.f32 %v1847_v38  ;;  %v1852_v40 = vld [vmem:[%s2881_s5] ss:$0 sm:$0xff] }
 0x720   :  { %2111 = vtanh.f32 %v1483_v58 }
 0x721   :  { %2113 = vpow2.f32 %v1848_v59 }
 0x72a   :  { %v2108_v60 = vpop.eup %2107 }
 0x72b   :  { %v1488_v61 = vadd.f32 1.0, %v2108_v60 }
 0x72c   :  { %v2110_v45 = vpop.eup %2109 }
 0x72d   :  { %2115 = vrcp.f32 %v1488_v61  ;;  %v1494_v63 = vadd.f32 1.0, %v2110_v45  ;;  %v2112_v46 = vpop.eup %2111 }
 0x72e   :  { %v2114_v1 = vpop.eup %2113 }
 0x72f   :  { %2117 = vrcp.f32 %v1494_v63  ;;  %v1501_v3 = vadd.f32 1.0, %v2114_v1 }
 0x731   :  { %2119 = vrcp.f32 %v1501_v3 }
 0x73a   :  { %v2116_v47 = vpop.eup %2115 }
 0x73b   :  { %v1505_v2 = vmul.f32 %v2116_v47, %v2112_v46 }
 0x73c   :  { %v2118_v48 = vpop.eup %2117 }
 0x73d   :  { %v1504_v4 = vmul.f32 %v2118_v48, %v2832_v0 }
 0x73e   :  { %v2120_v5 = vpop.eup %2119 }
 0x73f   :  { %v2862_v49 = vadd.f32 %v1505_v2, %v1504_v4 }
 0x741   :  { %2121 = vtanh.f32 %v2862_v49 }
 0x74e   :  { %v2122_v36 = vpop.eup %2121 }
 0x74f   :  { %v1508_v50 = vmul.f32 %v2122_v36, %v2120_v5 }
 0x751   :  { %v1513_v37 = vpack.c.bf16 %v1508_v50, %v1508_v50 }
 0x753   :  { %1547 = vmatmul.mubr.bf16.vlgmr.msra.gmra.mxu0 %v1513_v37  ;;  %1588 = vmatmul.mubr.bf16.vlgmr.msra.gmra.mxu1 %v1513_v37 }
 0x754   :  { %1871 = vmatpush3.bf16.msra.mxu0 %v2003_v51  ;;  %1886 = vmatprep.mubr.msk.bf16.mxu0 %vm2290_vm0, %v2289_v52 }
 0x755   :  { %1872 = vmatprep.subr.bf16.mxu0 %v2289_v52 }
 0x758   :  { %1873 = vmatpush3.bf16.msra.mxu0 %v2004_v54 }
 0x759   :  { %1874 = vmatprep.subr.bf16.mxu0 %v2289_v52 }
 0x75c   :  { %1875 = vmatpush3.bf16.msra.mxu0 %v2005_v55 }
 0x75d   :  { %1876 = vmatprep.subr.bf16.mxu0 %v2289_v52 }
 0x760   :  { %1877 = vmatpush3.bf16.msra.mxu0 %v2006_v56 }
 0x761   :  { %1878 = vmatprep.subr.bf16.mxu0 %v2289_v52 }
 0x764   :  { %1879 = vmatpush3.bf16.msra.mxu0 %v2007_v57 }
 0x765   :  { %1880 = vmatprep.subr.bf16.mxu0 %v2289_v52 }
 0x768   :  { %1881 = vmatpush3.bf16.msra.mxu0 %v2008_v6 }
 0x769   :  { %1882 = vmatprep.subr.bf16.mxu0 %v2289_v52 }
 0x76c   :  { %1883 = vmatpush3.bf16.msra.mxu0 %v2009_v27 }
 0x76d   :  { %1884 = vmatprep.subr.bf16.mxu0 %v2289_v52 }
 0x770   :  { %1885 = vmatpush3.bf16.msra.mxu0 %v2010_v22 }
 0x813   :  { %v1548_v18 = vpop.f32.mrf.mxu0  ;;  %v1589_v20 = vpop.f32.mrf.mxu1 }
 0x814   :  { %v1596_v0 = vadd.f32 %v1548_v18, %v2922_v24  ;;  %v1598_v30 = vadd.f32 %v1589_v20, %v2923_v26 }
 0x815   :  { %v1550_v28 = vpop.f32.mrf.mxu0  ;;  %v1591_v14 = vpop.f32.mrf.mxu1 }
 0x816   :  { %v1849_v15 = vmul.f32 -1.442695, %v1596_v0  ;;  %v1597_v12 = vadd.f32 %v1550_v28, %v2568_v31  ;;  %v1599_v62 = vadd.f32 %v1591_v14, %v2571_v44 }
 0x817   :  { %v1552_v10 = vpop.f32.mrf.mxu0  ;;  %v1593_v33 = vpop.f32.mrf.mxu1 }
 0x818   :  { %2123 = vpow2.f32 %v1849_v15  ;;  %v1850_v32 = vmul.f32 -1.442695, %v1597_v12  ;;  %v1851_v25 = vmul.f32 -1.442695, %v1599_v62 }
 0x819   :  { %v1553_v34 = vpop.f32.mrf.mxu0  ;;  %v1594_v13 = vpop.f32.mrf.mxu1 }
 0x81a   :  { %2125 = vpow2.f32 %v1850_v32 }
 0x81b   :  { %2127 = vtanh.f32 %v1598_v30 }
 0x81c   :  { %2129 = vpow2.f32 %v1851_v25 }
 0x825   :  { %v2124_v19 = vpop.eup %2123 }
 0x826   :  { %v1603_v17 = vadd.f32 1.0, %v2124_v19 }
 0x827   :  { %v2126_v23 = vpop.eup %2125 }
 0x828   :  { %2131 = vrcp.f32 %v1603_v17  ;;  %v1609_v8 = vadd.f32 1.0, %v2126_v23  ;;  %v2128_v31 = vpop.eup %2127 }
 0x829   :  { %v2130_v53 = vpop.eup %2129 }
 0x82a   :  { %2133 = vrcp.f32 %v1609_v8  ;;  %v1616_v21 = vadd.f32 1.0, %v2130_v53 }
 0x82c   :  { %2135 = vrcp.f32 %v1616_v21 }
 0x835   :  { %v2132_v7 = vpop.eup %2131 }
 0x836   :  { %v1620_v11 = vmul.f32 %v2132_v7, %v2128_v31 }
 0x837   :  { %v2134_v29 = vpop.eup %2133 }
 0x838   :  { %v1619_v35 = vmul.f32 %v2134_v29, %v2862_v49 }
 0x839   :  { %v2136_v16 = vpop.eup %2135 }
 0x83a   :  { %v1621_v44 = vadd.f32 %v1620_v11, %v1619_v35 }
 0x83c   :  { %2137 = vtanh.f32 %v1621_v44 }
 0x849   :  { %v2138_v9 = vpop.eup %2137 }
 0x84a   :  { %v1623_v38 = vmul.f32 %v2138_v9, %v2136_v16 }
 0x84c   :  { %v1630_v39 = vpack.c.bf16 %v1623_v38, %v1623_v38 }
 0x84e   :  { %1887 = vmatmul.mubr.bf16.vlgmr.msra.gmra.mxu0 %v1630_v39 }
 0x90e   :  { %v1736_v41 = vpop.f32.mrf.mxu0 }
 0x90f   :  { %v1737_v42 = vadd.f32 %v1852_v40, %v1736_v41 }
 0x910   :  { %v1888_v43 = vpop.f32.mrf.mxu0 }
 0x911   :  { %1742 = vst [vmem:[#allocation13] sm:$0xff] %v1737_v42 }
 0x912   :  { %v1739_v58 = vpop.f32.mrf.mxu0 }
 0x913   :  { %2262 = shalt.err (!%p2259_p10)
}
 0x914   :  { %1752 = dma.vmem_to_hbm [thread:$0]  %s1750_s21, 128, %s2882_s6, [#allocation7]   ;;  %v1889_v59 = vpop.f32.mrf.mxu0 }
 0x915   :  { %2277 = dma.done.wait [#allocation7], 128  }
 0x916   :  { %2278 = vsyncadd [#allocation7], 4294967168 }
 0x917   :  { %1756 = vsyncpa [#allocation6], 1 }
 0x918   :  { %1757 = vsyncpa [#allocation9], 1 }
 0x919   :  { %1758 = vsyncpa [#allocation12], 1 }
 0x91a   :  { %1759 = vsyncpa [#allocation7], 1 }

</bundles_post_ra>
